<compile_context>
chip_gen: v7x
topology: tpu7x:2x2x1
jax: 0.10.0
libtpu: 0.0.40
codegen_flags: <defaults>
</compile_context>

<pallas_src>
import jax
import jax.numpy as jnp
from jax.experimental import pallas as pl
from jax.experimental.pallas import tpu as pltpu

# ----------------------- config consistent with the module ------------------
BATCH = 2
T = 8                  # n_frames_input
C_IN = 4               # n_channels
H = W = 16
KS = 4                 # conv kernel == stride
OUT_CH = 4             # image_out_channel
OH = OW = H // KS      # image_out_size = (4, 4)
LATENT = OUT_CH * OH * OW          # image_latent_size = 64
HIDDEN = LATENT                    # hidden_size (must equal latent, see TODO)
OUT_SIZE = 16                      # output_size
NROWS = T * BATCH                  # 16 time-major rows
NPATCH = OH * OW                   # 16 patches per image
PATCH_K = C_IN * KS * KS           # 64 values per patch
NGATES = 4 * HIDDEN                # 256 gate lanes (natural packing, no pad)
HEADS_K = LATENT + HIDDEN          # 128 (fused head input: [latent | h])
HEADS_N = 128                      # head output padded to a full lane tile


# ------------------------------ fused kernel --------------------------------
def _fused_kernel(pf_ref, cw_ref, cb_ref,
                  wih_ref, whh_ref, lb_ref,
                  wh_ref, bh_ref,
                  out_ref):
    f32 = jnp.float32

    # 1) Conv(4x4, stride 4) + ReLU as a single matmul against the (pre-packed)
    #    block-diagonal weight; produces the NCHW-flattened latent directly.
    latent = jnp.dot(pf_ref[...], cw_ref[...], preferred_element_type=f32) + cb_ref[...]
    latent = jnp.maximum(latent, 0.0)                                   # (T*B, 64)

    # 2) LSTM input projection hoisted out of the recurrence (one wide matmul).
    xg = jnp.dot(latent, wih_ref[...], preferred_element_type=f32) + lb_ref[...]  # (T*B, 256)

    h = jnp.zeros((BATCH, HIDDEN), f32)
    c = jnp.zeros((BATCH, HIDDEN), f32)
    hs = []

    # 3) Recurrence, fully unrolled at trace time (T=8).  Only h @ W_hh is
    #    serial; W_hh (64, 256) is read from its VMEM ref per step (cheap vld,
    #    avoids keeping a large value live across the unrolled chain).
    for t in range(T):
        gates = xg[t * BATCH:(t + 1) * BATCH, :] + jnp.dot(
            h, whh_ref[...], preferred_element_type=f32)                # (B, 256)
        i = jax.nn.sigmoid(gates[:, 0 * HIDDEN:1 * HIDDEN])
        f = jax.nn.sigmoid(gates[:, 1 * HIDDEN:2 * HIDDEN])
        g = jnp.tanh(gates[:, 2 * HIDDEN:3 * HIDDEN])
        o = jax.nn.sigmoid(gates[:, 3 * HIDDEN:4 * HIDDEN])
        c = f * c + i * g
        h = o * jnp.tanh(c)
        hs.append(h)

    h_all = jnp.concatenate(hs, axis=0)                                 # (T*B, 64), stays in vregs

    # 4) All four heads as ONE matmul on [latent | h_all]; output padded to a
    #    full 128-lane tile so the final store is a single unmasked vst.
    feat = jnp.concatenate([latent, h_all], axis=1)                     # (T*B, 128)
    out_ref[...] = jnp.dot(feat, wh_ref[...], preferred_element_type=f32) + bh_ref[...]


_FUSED_CALL = pl.pallas_call(
    _fused_kernel,
    out_shape=jax.ShapeDtypeStruct((NROWS, HEADS_N), jnp.float32),
    compiler_params=pltpu.CompilerParams(
        allow_input_fusion=[True] * 8),      # let the im2col fuse into the input DMA
)


# --------------------- one-time parameter packing (hoisted) -------------------
def prepare_params(params):
    """Pack raw module parameters into kernel-ready layouts.  Call ONCE."""
    f32 = jnp.float32

    # Block-diagonal conv weight: latent[n, och*16 + rc] = sum_k pf[n, rc*64+k] * W2d[k, och].
    conv_w2d = params["conv_w"].reshape(OUT_CH, PATCH_K).T.astype(f32)        # (64, 4)
    eye_rc = jnp.eye(NPATCH, dtype=f32)                                       # (16, 16)
    w_big = jnp.einsum("ko,rs->rkos", conv_w2d, eye_rc).reshape(
        NPATCH * PATCH_K, OUT_CH * NPATCH)                                    # (1024, 64)
    b_lat = jnp.repeat(params["conv_b"].astype(f32), NPATCH).reshape(1, LATENT)

    # LSTM weights, natural i|f|g|o packing (torch gate order), biases summed.
    w_ih = params["lstm_w_ih"].T.astype(f32)                                  # (64, 256)
    w_hh = params["lstm_w_hh"].T.astype(f32)                                  # (64, 256)
    b_lstm = (params["lstm_b_ih"] + params["lstm_b_hh"]).astype(f32).reshape(1, NGATES)

    # Fused head weight: rows 0:64 act on the latent (spatial heads), rows
    # 64:128 on the LSTM output (temporal heads); output lanes 64:128 are zero
    # padding so the kernel's final store is lane-dense.
    w_sp = jnp.concatenate([params["sp_mu_w"].T, params["sp_sig_w"].T], axis=1).astype(f32)   # (64, 32)
    w_tp = jnp.concatenate([params["tp_mu_w"].T, params["tp_sig_w"].T], axis=1).astype(f32)   # (64, 32)
    z_32 = jnp.zeros((LATENT, 2 * OUT_SIZE), f32)
    z_pad = jnp.zeros((LATENT, HEADS_N - 4 * OUT_SIZE), f32)
    top = jnp.concatenate([w_sp, z_32, z_pad], axis=1)                        # (64, 128)
    bot = jnp.concatenate([z_32, w_tp, z_pad], axis=1)                        # (64, 128)
    w_heads = jnp.concatenate([top, bot], axis=0)                             # (128, 128)
    b_heads = jnp.concatenate(
        [params["sp_mu_b"], params["sp_sig_b"], params["tp_mu_b"], params["tp_sig_b"],
         jnp.zeros((HEADS_N - 4 * OUT_SIZE,), f32)]).astype(f32).reshape(1, HEADS_N)

    return {"w_big": w_big, "b_lat": b_lat, "w_ih": w_ih, "w_hh": w_hh,
            "b_lstm": b_lstm, "w_heads": w_heads, "b_heads": b_heads}


# --------------------------- per-call forward (jitted) ------------------------
def st_encoder_forward(x, packed):
    """x: (B, T, C, H, W) float32, packed: output of prepare_params().
    Returns 4 tensors of shape (B, T, OUT_SIZE)."""
    # Time-major flatten so the recurrence reads contiguous rows: row n = t*B + b.
    x_tm = jnp.transpose(x, (1, 0, 2, 3, 4)).reshape(NROWS, C_IN, H, W)

    # im2col for non-overlapping 4x4 patches (kernel == stride), patch order (C,kh,kw);
    # flattened per image as [rc, kk] so the conv is one (16, 1024) x (1024, 64) matmul.
    p = x_tm.reshape(NROWS, C_IN, OH, KS, OW, KS)
    p = jnp.transpose(p, (0, 2, 4, 1, 3, 5))            # (N, oh, ow, C, ks, ks)
    pf = p.reshape(NROWS, NPATCH * PATCH_K)             # (16, 1024)

    out = _FUSED_CALL(pf, packed["w_big"], packed["b_lat"],
                      packed["w_ih"], packed["w_hh"], packed["b_lstm"],
                      packed["w_heads"], packed["b_heads"])

    # (T*B, 128) time-major -> (B, T, 128) -> slice the four heads from lanes 0:64.
    out = jnp.transpose(out.reshape(T, BATCH, HEADS_N), (1, 0, 2))
    spatial_mu = out[..., 0 * OUT_SIZE:1 * OUT_SIZE]
    spatial_sigma = out[..., 1 * OUT_SIZE:2 * OUT_SIZE]
    temporal_mu = out[..., 2 * OUT_SIZE:3 * OUT_SIZE]
    temporal_sigma = out[..., 3 * OUT_SIZE:4 * OUT_SIZE]
    return spatial_mu, spatial_sigma, temporal_mu, temporal_sigma


# --------------------------- pure-JAX reference ------------------------------
def reference_forward(x, params):
    B, Tn, C, Hh, Ww = x.shape
    x_flat = x.reshape(B * Tn, C, Hh, Ww)
    p = x_flat.reshape(B * Tn, C, OH, KS, OW, KS)
    p = jnp.transpose(p, (0, 2, 4, 1, 3, 5))
    patches = p.reshape(B * Tn * OH * OW, C * KS * KS)
    conv_w2d = params["conv_w"].reshape(OUT_CH, -1).T
    feat = jnp.maximum(patches @ conv_w2d + params["conv_b"], 0.0)
    feat = feat.reshape(B * Tn, OH, OW, OUT_CH).transpose(0, 3, 1, 2)   # NCHW
    input_reprs = feat.reshape(B, Tn, LATENT)

    w_ih_t, w_hh_t = params["lstm_w_ih"].T, params["lstm_w_hh"].T
    bias = params["lstm_b_ih"] + params["lstm_b_hh"]

    def step(carry, x_t):
        h, c = carry
        gates = x_t @ w_ih_t + h @ w_hh_t + bias
        i, f, g, o = jnp.split(gates, 4, axis=-1)
        i, f, o = jax.nn.sigmoid(i), jax.nn.sigmoid(f), jax.nn.sigmoid(o)
        g = jnp.tanh(g)
        c = f * c + i * g
        h = o * jnp.tanh(c)
        return (h, c), h

    h0 = jnp.zeros((B, HIDDEN), jnp.float32)
    c0 = jnp.zeros((B, HIDDEN), jnp.float32)
    _, outs = jax.lax.scan(step, (h0, c0), jnp.transpose(input_reprs, (1, 0, 2)))
    lstm_out = jnp.transpose(outs, (1, 0, 2)).reshape(B * Tn, HIDDEN)
    flat = input_reprs.reshape(B * Tn, LATENT)

    def lin(xx, w, b):
        return (xx @ w.T + b).reshape(B, Tn, OUT_SIZE)

    return (lin(flat, params["sp_mu_w"], params["sp_mu_b"]),
            lin(flat, params["sp_sig_w"], params["sp_sig_b"]),
            lin(lstm_out, params["tp_mu_w"], params["tp_mu_b"]),
            lin(lstm_out, params["tp_sig_w"], params["tp_sig_b"]))


# ----------------------------------- main -------------------------------------
def _init_params(key):
    ks = jax.random.split(key, 16)
    n = lambda k, shape: (0.1 * jax.random.normal(k, shape)).astype(jnp.float32)
    return {
        "conv_w": n(ks[0], (OUT_CH, C_IN, KS, KS)),
        "conv_b": n(ks[1], (OUT_CH,)),
        "lstm_w_ih": n(ks[2], (4 * HIDDEN, LATENT)),
        "lstm_w_hh": n(ks[3], (4 * HIDDEN, HIDDEN)),
        "lstm_b_ih": n(ks[4], (4 * HIDDEN,)),
        "lstm_b_hh": n(ks[5], (4 * HIDDEN,)),
        "sp_mu_w": n(ks[6], (OUT_SIZE, LATENT)),   "sp_mu_b": n(ks[7], (OUT_SIZE,)),
        "sp_sig_w": n(ks[8], (OUT_SIZE, LATENT)),  "sp_sig_b": n(ks[9], (OUT_SIZE,)),
        "tp_mu_w": n(ks[10], (OUT_SIZE, LATENT)),  "tp_mu_b": n(ks[11], (OUT_SIZE,)),
        "tp_sig_w": n(ks[12], (OUT_SIZE, LATENT)), "tp_sig_b": n(ks[13], (OUT_SIZE,)),
    }


if __name__ == "__main__":
    key = jax.random.PRNGKey(0)
    pkey, xkey = jax.random.split(key)
    params = _init_params(pkey)
    x = jax.random.normal(xkey, (BATCH, T, C_IN, H, W), dtype=jnp.float32)

    # Parameter packing happens ONCE, outside the jitted per-call path.
    packed = jax.tree_util.tree_map(jax.device_put, prepare_params(params))

    fwd = jax.jit(st_encoder_forward)
    outs = jax.block_until_ready(fwd(x, packed))

    refs = jax.block_until_ready(jax.jit(reference_forward)(x, params))

    for o, r in zip(outs, refs):
        assert o.shape == (BATCH, T, OUT_SIZE), f"bad shape {o.shape}"
        assert jnp.allclose(o, r, atol=2e-4, rtol=2e-4), "mismatch vs reference"

    print("KERNEL_OK")
</pallas_src>

<mosaic_0001>
module attributes {stable_mosaic.version = 11 : i64} {
  func.func @_fused_kernel(%arg0: memref<16x1024xf32, #tpu.memory_space<vmem>>, %arg1: memref<1024x64xf32, #tpu.memory_space<vmem>>, %arg2: memref<1x64xf32, #tpu.memory_space<vmem>>, %arg3: memref<64x256xf32, #tpu.memory_space<vmem>>, %arg4: memref<64x256xf32, #tpu.memory_space<vmem>>, %arg5: memref<1x256xf32, #tpu.memory_space<vmem>>, %arg6: memref<128x128xf32, #tpu.memory_space<vmem>>, %arg7: memref<1x128xf32, #tpu.memory_space<vmem>>, %arg8: memref<16x128xf32, #tpu.memory_space<vmem>>) attributes {dimension_semantics = [], scalar_prefetch = 0 : i64, scratch_operands = 0 : i64, tpu.core_type = #tpu.core_type<tc>} {
    %c0 = arith.constant 0 : index
    %c0_0 = arith.constant 0 : index
    %0 = vector.load %arg0[%c0, %c0_0] : memref<16x1024xf32, #tpu.memory_space<vmem>>, vector<16x1024xf32>
    %c0_1 = arith.constant 0 : index
    %c0_2 = arith.constant 0 : index
    %1 = vector.load %arg1[%c0_1, %c0_2] : memref<1024x64xf32, #tpu.memory_space<vmem>>, vector<1024x64xf32>
    %cst = arith.constant dense<0.000000e+00> : vector<16x64xf32>
    %2 = tpu.matmul %0, %1, %cst {dimension_numbers = #tpu.dot_dimension_numbers<[1], [0], [0], [1], [0, 0, 1, 1], [], []>} : vector<16x1024xf32>, vector<1024x64xf32>, vector<16x64xf32> -> vector<16x64xf32>
    %c0_3 = arith.constant 0 : index
    %c0_4 = arith.constant 0 : index
    %3 = vector.load %arg2[%c0_3, %c0_4] : memref<1x64xf32, #tpu.memory_space<vmem>>, vector<1x64xf32>
    %4 = vector.broadcast %3 : vector<1x64xf32> to vector<16x64xf32>
    %5 = arith.addf %2, %4 : vector<16x64xf32>
    %cst_5 = arith.constant 0.000000e+00 : f32
    %6 = vector.broadcast %cst_5 : f32 to vector<16x64xf32>
    %7 = arith.maximumf %5, %6 : vector<16x64xf32>
    %c0_6 = arith.constant 0 : index
    %c0_7 = arith.constant 0 : index
    %8 = vector.load %arg3[%c0_6, %c0_7] : memref<64x256xf32, #tpu.memory_space<vmem>>, vector<64x256xf32>
    %cst_8 = arith.constant dense<0.000000e+00> : vector<16x256xf32>
    %9 = tpu.matmul %7, %8, %cst_8 {dimension_numbers = #tpu.dot_dimension_numbers<[1], [0], [0], [1], [0, 0, 1, 1], [], []>} : vector<16x64xf32>, vector<64x256xf32>, vector<16x256xf32> -> vector<16x256xf32>
    %c0_9 = arith.constant 0 : index
    %c0_10 = arith.constant 0 : index
    %10 = vector.load %arg5[%c0_9, %c0_10] : memref<1x256xf32, #tpu.memory_space<vmem>>, vector<1x256xf32>
    %11 = vector.broadcast %10 : vector<1x256xf32> to vector<16x256xf32>
    %12 = arith.addf %9, %11 : vector<16x256xf32>
    %cst_11 = arith.constant 0.000000e+00 : f32
    %13 = vector.broadcast %cst_11 : f32 to vector<2x64xf32>
    %cst_12 = arith.constant 0.000000e+00 : f32
    %14 = vector.broadcast %cst_12 : f32 to vector<2x64xf32>
    %15 = vector.extract_strided_slice %12 {offsets = [0, 0], sizes = [2, 256], strides = [1, 1]} : vector<16x256xf32> to vector<2x256xf32>
    %c0_13 = arith.constant 0 : index
    %c0_14 = arith.constant 0 : index
    %16 = vector.load %arg4[%c0_13, %c0_14] : memref<64x256xf32, #tpu.memory_space<vmem>>, vector<64x256xf32>
    %cst_15 = arith.constant dense<0.000000e+00> : vector<2x256xf32>
    %17 = tpu.matmul %13, %16, %cst_15 {dimension_numbers = #tpu.dot_dimension_numbers<[1], [0], [0], [1], [0, 0, 1, 1], [], []>} : vector<2x64xf32>, vector<64x256xf32>, vector<2x256xf32> -> vector<2x256xf32>
    %18 = arith.addf %15, %17 : vector<2x256xf32>
    %19 = vector.extract_strided_slice %18 {offsets = [0, 0], sizes = [2, 64], strides = [1, 1]} : vector<2x256xf32> to vector<2x64xf32>
    %20 = arith.negf %19 : vector<2x64xf32>
    %21 = math.exp %20 : vector<2x64xf32>
    %cst_16 = arith.constant 1.000000e+00 : f32
    %22 = vector.broadcast %cst_16 : f32 to vector<2x64xf32>
    %23 = arith.addf %22, %21 : vector<2x64xf32>
    %24 = arith.divf %22, %23 : vector<2x64xf32>
    %25 = vector.extract_strided_slice %18 {offsets = [0, 64], sizes = [2, 64], strides = [1, 1]} : vector<2x256xf32> to vector<2x64xf32>
    %26 = arith.negf %25 : vector<2x64xf32>
    %27 = math.exp %26 : vector<2x64xf32>
    %cst_17 = arith.constant 1.000000e+00 : f32
    %28 = vector.broadcast %cst_17 : f32 to vector<2x64xf32>
    %29 = arith.addf %28, %27 : vector<2x64xf32>
    %30 = arith.divf %28, %29 : vector<2x64xf32>
    %31 = vector.extract_strided_slice %18 {offsets = [0, 128], sizes = [2, 64], strides = [1, 1]} : vector<2x256xf32> to vector<2x64xf32>
    %32 = math.tanh %31 : vector<2x64xf32>
    %33 = vector.extract_strided_slice %18 {offsets = [0, 192], sizes = [2, 64], strides = [1, 1]} : vector<2x256xf32> to vector<2x64xf32>
    %34 = arith.negf %33 : vector<2x64xf32>
    %35 = math.exp %34 : vector<2x64xf32>
    %cst_18 = arith.constant 1.000000e+00 : f32
    %36 = vector.broadcast %cst_18 : f32 to vector<2x64xf32>
    %37 = arith.addf %36, %35 : vector<2x64xf32>
    %38 = arith.divf %36, %37 : vector<2x64xf32>
    %39 = arith.mulf %30, %14 : vector<2x64xf32>
    %40 = arith.mulf %24, %32 : vector<2x64xf32>
    %41 = arith.addf %39, %40 : vector<2x64xf32>
    %42 = math.tanh %41 : vector<2x64xf32>
    %43 = arith.mulf %38, %42 : vector<2x64xf32>
    %44 = vector.extract_strided_slice %12 {offsets = [2, 0], sizes = [2, 256], strides = [1, 1]} : vector<16x256xf32> to vector<2x256xf32>
    %c0_19 = arith.constant 0 : index
    %c0_20 = arith.constant 0 : index
    %45 = vector.load %arg4[%c0_19, %c0_20] : memref<64x256xf32, #tpu.memory_space<vmem>>, vector<64x256xf32>
    %cst_21 = arith.constant dense<0.000000e+00> : vector<2x256xf32>
    %46 = tpu.matmul %43, %45, %cst_21 {dimension_numbers = #tpu.dot_dimension_numbers<[1], [0], [0], [1], [0, 0, 1, 1], [], []>} : vector<2x64xf32>, vector<64x256xf32>, vector<2x256xf32> -> vector<2x256xf32>
    %47 = arith.addf %44, %46 : vector<2x256xf32>
    %48 = vector.extract_strided_slice %47 {offsets = [0, 0], sizes = [2, 64], strides = [1, 1]} : vector<2x256xf32> to vector<2x64xf32>
    %49 = arith.negf %48 : vector<2x64xf32>
    %50 = math.exp %49 : vector<2x64xf32>
    %cst_22 = arith.constant 1.000000e+00 : f32
    %51 = vector.broadcast %cst_22 : f32 to vector<2x64xf32>
    %52 = arith.addf %51, %50 : vector<2x64xf32>
    %53 = arith.divf %51, %52 : vector<2x64xf32>
    %54 = vector.extract_strided_slice %47 {offsets = [0, 64], sizes = [2, 64], strides = [1, 1]} : vector<2x256xf32> to vector<2x64xf32>
    %55 = arith.negf %54 : vector<2x64xf32>
    %56 = math.exp %55 : vector<2x64xf32>
    %cst_23 = arith.constant 1.000000e+00 : f32
    %57 = vector.broadcast %cst_23 : f32 to vector<2x64xf32>
    %58 = arith.addf %57, %56 : vector<2x64xf32>
    %59 = arith.divf %57, %58 : vector<2x64xf32>
    %60 = vector.extract_strided_slice %47 {offsets = [0, 128], sizes = [2, 64], strides = [1, 1]} : vector<2x256xf32> to vector<2x64xf32>
    %61 = math.tanh %60 : vector<2x64xf32>
    %62 = vector.extract_strided_slice %47 {offsets = [0, 192], sizes = [2, 64], strides = [1, 1]} : vector<2x256xf32> to vector<2x64xf32>
    %63 = arith.negf %62 : vector<2x64xf32>
    %64 = math.exp %63 : vector<2x64xf32>
    %cst_24 = arith.constant 1.000000e+00 : f32
    %65 = vector.broadcast %cst_24 : f32 to vector<2x64xf32>
    %66 = arith.addf %65, %64 : vector<2x64xf32>
    %67 = arith.divf %65, %66 : vector<2x64xf32>
    %68 = arith.mulf %59, %41 : vector<2x64xf32>
    %69 = arith.mulf %53, %61 : vector<2x64xf32>
    %70 = arith.addf %68, %69 : vector<2x64xf32>
    %71 = math.tanh %70 : vector<2x64xf32>
    %72 = arith.mulf %67, %71 : vector<2x64xf32>
    %73 = vector.extract_strided_slice %12 {offsets = [4, 0], sizes = [2, 256], strides = [1, 1]} : vector<16x256xf32> to vector<2x256xf32>
    %c0_25 = arith.constant 0 : index
    %c0_26 = arith.constant 0 : index
    %74 = vector.load %arg4[%c0_25, %c0_26] : memref<64x256xf32, #tpu.memory_space<vmem>>, vector<64x256xf32>
    %cst_27 = arith.constant dense<0.000000e+00> : vector<2x256xf32>
    %75 = tpu.matmul %72, %74, %cst_27 {dimension_numbers = #tpu.dot_dimension_numbers<[1], [0], [0], [1], [0, 0, 1, 1], [], []>} : vector<2x64xf32>, vector<64x256xf32>, vector<2x256xf32> -> vector<2x256xf32>
    %76 = arith.addf %73, %75 : vector<2x256xf32>
    %77 = vector.extract_strided_slice %76 {offsets = [0, 0], sizes = [2, 64], strides = [1, 1]} : vector<2x256xf32> to vector<2x64xf32>
    %78 = arith.negf %77 : vector<2x64xf32>
    %79 = math.exp %78 : vector<2x64xf32>
    %cst_28 = arith.constant 1.000000e+00 : f32
    %80 = vector.broadcast %cst_28 : f32 to vector<2x64xf32>
    %81 = arith.addf %80, %79 : vector<2x64xf32>
    %82 = arith.divf %80, %81 : vector<2x64xf32>
    %83 = vector.extract_strided_slice %76 {offsets = [0, 64], sizes = [2, 64], strides = [1, 1]} : vector<2x256xf32> to vector<2x64xf32>
    %84 = arith.negf %83 : vector<2x64xf32>
    %85 = math.exp %84 : vector<2x64xf32>
    %cst_29 = arith.constant 1.000000e+00 : f32
    %86 = vector.broadcast %cst_29 : f32 to vector<2x64xf32>
    %87 = arith.addf %86, %85 : vector<2x64xf32>
    %88 = arith.divf %86, %87 : vector<2x64xf32>
    %89 = vector.extract_strided_slice %76 {offsets = [0, 128], sizes = [2, 64], strides = [1, 1]} : vector<2x256xf32> to vector<2x64xf32>
    %90 = math.tanh %89 : vector<2x64xf32>
    %91 = vector.extract_strided_slice %76 {offsets = [0, 192], sizes = [2, 64], strides = [1, 1]} : vector<2x256xf32> to vector<2x64xf32>
    %92 = arith.negf %91 : vector<2x64xf32>
    %93 = math.exp %92 : vector<2x64xf32>
    %cst_30 = arith.constant 1.000000e+00 : f32
    %94 = vector.broadcast %cst_30 : f32 to vector<2x64xf32>
    %95 = arith.addf %94, %93 : vector<2x64xf32>
    %96 = arith.divf %94, %95 : vector<2x64xf32>
    %97 = arith.mulf %88, %70 : vector<2x64xf32>
    %98 = arith.mulf %82, %90 : vector<2x64xf32>
    %99 = arith.addf %97, %98 : vector<2x64xf32>
    %100 = math.tanh %99 : vector<2x64xf32>
    %101 = arith.mulf %96, %100 : vector<2x64xf32>
    %102 = vector.extract_strided_slice %12 {offsets = [6, 0], sizes = [2, 256], strides = [1, 1]} : vector<16x256xf32> to vector<2x256xf32>
    %c0_31 = arith.constant 0 : index
    %c0_32 = arith.constant 0 : index
    %103 = vector.load %arg4[%c0_31, %c0_32] : memref<64x256xf32, #tpu.memory_space<vmem>>, vector<64x256xf32>
    %cst_33 = arith.constant dense<0.000000e+00> : vector<2x256xf32>
    %104 = tpu.matmul %101, %103, %cst_33 {dimension_numbers = #tpu.dot_dimension_numbers<[1], [0], [0], [1], [0, 0, 1, 1], [], []>} : vector<2x64xf32>, vector<64x256xf32>, vector<2x256xf32> -> vector<2x256xf32>
    %105 = arith.addf %102, %104 : vector<2x256xf32>
    %106 = vector.extract_strided_slice %105 {offsets = [0, 0], sizes = [2, 64], strides = [1, 1]} : vector<2x256xf32> to vector<2x64xf32>
    %107 = arith.negf %106 : vector<2x64xf32>
    %108 = math.exp %107 : vector<2x64xf32>
    %cst_34 = arith.constant 1.000000e+00 : f32
    %109 = vector.broadcast %cst_34 : f32 to vector<2x64xf32>
    %110 = arith.addf %109, %108 : vector<2x64xf32>
    %111 = arith.divf %109, %110 : vector<2x64xf32>
    %112 = vector.extract_strided_slice %105 {offsets = [0, 64], sizes = [2, 64], strides = [1, 1]} : vector<2x256xf32> to vector<2x64xf32>
    %113 = arith.negf %112 : vector<2x64xf32>
    %114 = math.exp %113 : vector<2x64xf32>
    %cst_35 = arith.constant 1.000000e+00 : f32
    %115 = vector.broadcast %cst_35 : f32 to vector<2x64xf32>
    %116 = arith.addf %115, %114 : vector<2x64xf32>
    %117 = arith.divf %115, %116 : vector<2x64xf32>
    %118 = vector.extract_strided_slice %105 {offsets = [0, 128], sizes = [2, 64], strides = [1, 1]} : vector<2x256xf32> to vector<2x64xf32>
    %119 = math.tanh %118 : vector<2x64xf32>
    %120 = vector.extract_strided_slice %105 {offsets = [0, 192], sizes = [2, 64], strides = [1, 1]} : vector<2x256xf32> to vector<2x64xf32>
    %121 = arith.negf %120 : vector<2x64xf32>
    %122 = math.exp %121 : vector<2x64xf32>
    %cst_36 = arith.constant 1.000000e+00 : f32
    %123 = vector.broadcast %cst_36 : f32 to vector<2x64xf32>
    %124 = arith.addf %123, %122 : vector<2x64xf32>
    %125 = arith.divf %123, %124 : vector<2x64xf32>
    %126 = arith.mulf %117, %99 : vector<2x64xf32>
    %127 = arith.mulf %111, %119 : vector<2x64xf32>
    %128 = arith.addf %126, %127 : vector<2x64xf32>
    %129 = math.tanh %128 : vector<2x64xf32>
    %130 = arith.mulf %125, %129 : vector<2x64xf32>
    %131 = vector.extract_strided_slice %12 {offsets = [8, 0], sizes = [2, 256], strides = [1, 1]} : vector<16x256xf32> to vector<2x256xf32>
    %c0_37 = arith.constant 0 : index
    %c0_38 = arith.constant 0 : index
    %132 = vector.load %arg4[%c0_37, %c0_38] : memref<64x256xf32, #tpu.memory_space<vmem>>, vector<64x256xf32>
    %cst_39 = arith.constant dense<0.000000e+00> : vector<2x256xf32>
    %133 = tpu.matmul %130, %132, %cst_39 {dimension_numbers = #tpu.dot_dimension_numbers<[1], [0], [0], [1], [0, 0, 1, 1], [], []>} : vector<2x64xf32>, vector<64x256xf32>, vector<2x256xf32> -> vector<2x256xf32>
    %134 = arith.addf %131, %133 : vector<2x256xf32>
    %135 = vector.extract_strided_slice %134 {offsets = [0, 0], sizes = [2, 64], strides = [1, 1]} : vector<2x256xf32> to vector<2x64xf32>
    %136 = arith.negf %135 : vector<2x64xf32>
    %137 = math.exp %136 : vector<2x64xf32>
    %cst_40 = arith.constant 1.000000e+00 : f32
    %138 = vector.broadcast %cst_40 : f32 to vector<2x64xf32>
    %139 = arith.addf %138, %137 : vector<2x64xf32>
    %140 = arith.divf %138, %139 : vector<2x64xf32>
    %141 = vector.extract_strided_slice %134 {offsets = [0, 64], sizes = [2, 64], strides = [1, 1]} : vector<2x256xf32> to vector<2x64xf32>
    %142 = arith.negf %141 : vector<2x64xf32>
    %143 = math.exp %142 : vector<2x64xf32>
    %cst_41 = arith.constant 1.000000e+00 : f32
    %144 = vector.broadcast %cst_41 : f32 to vector<2x64xf32>
    %145 = arith.addf %144, %143 : vector<2x64xf32>
    %146 = arith.divf %144, %145 : vector<2x64xf32>
    %147 = vector.extract_strided_slice %134 {offsets = [0, 128], sizes = [2, 64], strides = [1, 1]} : vector<2x256xf32> to vector<2x64xf32>
    %148 = math.tanh %147 : vector<2x64xf32>
    %149 = vector.extract_strided_slice %134 {offsets = [0, 192], sizes = [2, 64], strides = [1, 1]} : vector<2x256xf32> to vector<2x64xf32>
    %150 = arith.negf %149 : vector<2x64xf32>
    %151 = math.exp %150 : vector<2x64xf32>
    %cst_42 = arith.constant 1.000000e+00 : f32
    %152 = vector.broadcast %cst_42 : f32 to vector<2x64xf32>
    %153 = arith.addf %152, %151 : vector<2x64xf32>
    %154 = arith.divf %152, %153 : vector<2x64xf32>
    %155 = arith.mulf %146, %128 : vector<2x64xf32>
    %156 = arith.mulf %140, %148 : vector<2x64xf32>
    %157 = arith.addf %155, %156 : vector<2x64xf32>
    %158 = math.tanh %157 : vector<2x64xf32>
    %159 = arith.mulf %154, %158 : vector<2x64xf32>
    %160 = vector.extract_strided_slice %12 {offsets = [10, 0], sizes = [2, 256], strides = [1, 1]} : vector<16x256xf32> to vector<2x256xf32>
    %c0_43 = arith.constant 0 : index
    %c0_44 = arith.constant 0 : index
    %161 = vector.load %arg4[%c0_43, %c0_44] : memref<64x256xf32, #tpu.memory_space<vmem>>, vector<64x256xf32>
    %cst_45 = arith.constant dense<0.000000e+00> : vector<2x256xf32>
    %162 = tpu.matmul %159, %161, %cst_45 {dimension_numbers = #tpu.dot_dimension_numbers<[1], [0], [0], [1], [0, 0, 1, 1], [], []>} : vector<2x64xf32>, vector<64x256xf32>, vector<2x256xf32> -> vector<2x256xf32>
    %163 = arith.addf %160, %162 : vector<2x256xf32>
    %164 = vector.extract_strided_slice %163 {offsets = [0, 0], sizes = [2, 64], strides = [1, 1]} : vector<2x256xf32> to vector<2x64xf32>
    %165 = arith.negf %164 : vector<2x64xf32>
    %166 = math.exp %165 : vector<2x64xf32>
    %cst_46 = arith.constant 1.000000e+00 : f32
    %167 = vector.broadcast %cst_46 : f32 to vector<2x64xf32>
    %168 = arith.addf %167, %166 : vector<2x64xf32>
    %169 = arith.divf %167, %168 : vector<2x64xf32>
    %170 = vector.extract_strided_slice %163 {offsets = [0, 64], sizes = [2, 64], strides = [1, 1]} : vector<2x256xf32> to vector<2x64xf32>
    %171 = arith.negf %170 : vector<2x64xf32>
    %172 = math.exp %171 : vector<2x64xf32>
    %cst_47 = arith.constant 1.000000e+00 : f32
    %173 = vector.broadcast %cst_47 : f32 to vector<2x64xf32>
    %174 = arith.addf %173, %172 : vector<2x64xf32>
    %175 = arith.divf %173, %174 : vector<2x64xf32>
    %176 = vector.extract_strided_slice %163 {offsets = [0, 128], sizes = [2, 64], strides = [1, 1]} : vector<2x256xf32> to vector<2x64xf32>
    %177 = math.tanh %176 : vector<2x64xf32>
    %178 = vector.extract_strided_slice %163 {offsets = [0, 192], sizes = [2, 64], strides = [1, 1]} : vector<2x256xf32> to vector<2x64xf32>
    %179 = arith.negf %178 : vector<2x64xf32>
    %180 = math.exp %179 : vector<2x64xf32>
    %cst_48 = arith.constant 1.000000e+00 : f32
    %181 = vector.broadcast %cst_48 : f32 to vector<2x64xf32>
    %182 = arith.addf %181, %180 : vector<2x64xf32>
    %183 = arith.divf %181, %182 : vector<2x64xf32>
    %184 = arith.mulf %175, %157 : vector<2x64xf32>
    %185 = arith.mulf %169, %177 : vector<2x64xf32>
    %186 = arith.addf %184, %185 : vector<2x64xf32>
    %187 = math.tanh %186 : vector<2x64xf32>
    %188 = arith.mulf %183, %187 : vector<2x64xf32>
    %189 = vector.extract_strided_slice %12 {offsets = [12, 0], sizes = [2, 256], strides = [1, 1]} : vector<16x256xf32> to vector<2x256xf32>
    %c0_49 = arith.constant 0 : index
    %c0_50 = arith.constant 0 : index
    %190 = vector.load %arg4[%c0_49, %c0_50] : memref<64x256xf32, #tpu.memory_space<vmem>>, vector<64x256xf32>
    %cst_51 = arith.constant dense<0.000000e+00> : vector<2x256xf32>
    %191 = tpu.matmul %188, %190, %cst_51 {dimension_numbers = #tpu.dot_dimension_numbers<[1], [0], [0], [1], [0, 0, 1, 1], [], []>} : vector<2x64xf32>, vector<64x256xf32>, vector<2x256xf32> -> vector<2x256xf32>
    %192 = arith.addf %189, %191 : vector<2x256xf32>
    %193 = vector.extract_strided_slice %192 {offsets = [0, 0], sizes = [2, 64], strides = [1, 1]} : vector<2x256xf32> to vector<2x64xf32>
    %194 = arith.negf %193 : vector<2x64xf32>
    %195 = math.exp %194 : vector<2x64xf32>
    %cst_52 = arith.constant 1.000000e+00 : f32
    %196 = vector.broadcast %cst_52 : f32 to vector<2x64xf32>
    %197 = arith.addf %196, %195 : vector<2x64xf32>
    %198 = arith.divf %196, %197 : vector<2x64xf32>
    %199 = vector.extract_strided_slice %192 {offsets = [0, 64], sizes = [2, 64], strides = [1, 1]} : vector<2x256xf32> to vector<2x64xf32>
    %200 = arith.negf %199 : vector<2x64xf32>
    %201 = math.exp %200 : vector<2x64xf32>
    %cst_53 = arith.constant 1.000000e+00 : f32
    %202 = vector.broadcast %cst_53 : f32 to vector<2x64xf32>
    %203 = arith.addf %202, %201 : vector<2x64xf32>
    %204 = arith.divf %202, %203 : vector<2x64xf32>
    %205 = vector.extract_strided_slice %192 {offsets = [0, 128], sizes = [2, 64], strides = [1, 1]} : vector<2x256xf32> to vector<2x64xf32>
    %206 = math.tanh %205 : vector<2x64xf32>
    %207 = vector.extract_strided_slice %192 {offsets = [0, 192], sizes = [2, 64], strides = [1, 1]} : vector<2x256xf32> to vector<2x64xf32>
    %208 = arith.negf %207 : vector<2x64xf32>
    %209 = math.exp %208 : vector<2x64xf32>
    %cst_54 = arith.constant 1.000000e+00 : f32
    %210 = vector.broadcast %cst_54 : f32 to vector<2x64xf32>
    %211 = arith.addf %210, %209 : vector<2x64xf32>
    %212 = arith.divf %210, %211 : vector<2x64xf32>
    %213 = arith.mulf %204, %186 : vector<2x64xf32>
    %214 = arith.mulf %198, %206 : vector<2x64xf32>
    %215 = arith.addf %213, %214 : vector<2x64xf32>
    %216 = math.tanh %215 : vector<2x64xf32>
    %217 = arith.mulf %212, %216 : vector<2x64xf32>
    %218 = vector.extract_strided_slice %12 {offsets = [14, 0], sizes = [2, 256], strides = [1, 1]} : vector<16x256xf32> to vector<2x256xf32>
    %c0_55 = arith.constant 0 : index
    %c0_56 = arith.constant 0 : index
    %219 = vector.load %arg4[%c0_55, %c0_56] : memref<64x256xf32, #tpu.memory_space<vmem>>, vector<64x256xf32>
    %cst_57 = arith.constant dense<0.000000e+00> : vector<2x256xf32>
    %220 = tpu.matmul %217, %219, %cst_57 {dimension_numbers = #tpu.dot_dimension_numbers<[1], [0], [0], [1], [0, 0, 1, 1], [], []>} : vector<2x64xf32>, vector<64x256xf32>, vector<2x256xf32> -> vector<2x256xf32>
    %221 = arith.addf %218, %220 : vector<2x256xf32>
    %222 = vector.extract_strided_slice %221 {offsets = [0, 0], sizes = [2, 64], strides = [1, 1]} : vector<2x256xf32> to vector<2x64xf32>
    %223 = arith.negf %222 : vector<2x64xf32>
    %224 = math.exp %223 : vector<2x64xf32>
    %cst_58 = arith.constant 1.000000e+00 : f32
    %225 = vector.broadcast %cst_58 : f32 to vector<2x64xf32>
    %226 = arith.addf %225, %224 : vector<2x64xf32>
    %227 = arith.divf %225, %226 : vector<2x64xf32>
    %228 = vector.extract_strided_slice %221 {offsets = [0, 64], sizes = [2, 64], strides = [1, 1]} : vector<2x256xf32> to vector<2x64xf32>
    %229 = arith.negf %228 : vector<2x64xf32>
    %230 = math.exp %229 : vector<2x64xf32>
    %cst_59 = arith.constant 1.000000e+00 : f32
    %231 = vector.broadcast %cst_59 : f32 to vector<2x64xf32>
    %232 = arith.addf %231, %230 : vector<2x64xf32>
    %233 = arith.divf %231, %232 : vector<2x64xf32>
    %234 = vector.extract_strided_slice %221 {offsets = [0, 128], sizes = [2, 64], strides = [1, 1]} : vector<2x256xf32> to vector<2x64xf32>
    %235 = math.tanh %234 : vector<2x64xf32>
    %236 = vector.extract_strided_slice %221 {offsets = [0, 192], sizes = [2, 64], strides = [1, 1]} : vector<2x256xf32> to vector<2x64xf32>
    %237 = arith.negf %236 : vector<2x64xf32>
    %238 = math.exp %237 : vector<2x64xf32>
    %cst_60 = arith.constant 1.000000e+00 : f32
    %239 = vector.broadcast %cst_60 : f32 to vector<2x64xf32>
    %240 = arith.addf %239, %238 : vector<2x64xf32>
    %241 = arith.divf %239, %240 : vector<2x64xf32>
    %242 = arith.mulf %233, %215 : vector<2x64xf32>
    %243 = arith.mulf %227, %235 : vector<2x64xf32>
    %244 = arith.addf %242, %243 : vector<2x64xf32>
    %245 = math.tanh %244 : vector<2x64xf32>
    %246 = arith.mulf %241, %245 : vector<2x64xf32>
    %247 = tpu.concatenate %43, %72, %101, %130, %159, %188, %217, %246 in 0 : vector<2x64xf32>, vector<2x64xf32>, vector<2x64xf32>, vector<2x64xf32>, vector<2x64xf32>, vector<2x64xf32>, vector<2x64xf32>, vector<2x64xf32> -> vector<16x64xf32>
    %248 = tpu.concatenate %7, %247 in 1 : vector<16x64xf32>, vector<16x64xf32> -> vector<16x128xf32>
    %c0_61 = arith.constant 0 : index
    %c0_62 = arith.constant 0 : index
    %249 = vector.load %arg6[%c0_61, %c0_62] : memref<128x128xf32, #tpu.memory_space<vmem>>, vector<128x128xf32>
    %cst_63 = arith.constant dense<0.000000e+00> : vector<16x128xf32>
    %250 = tpu.matmul %248, %249, %cst_63 {dimension_numbers = #tpu.dot_dimension_numbers<[1], [0], [0], [1], [0, 0, 1, 1], [], []>} : vector<16x128xf32>, vector<128x128xf32>, vector<16x128xf32> -> vector<16x128xf32>
    %c0_64 = arith.constant 0 : index
    %c0_65 = arith.constant 0 : index
    %251 = vector.load %arg7[%c0_64, %c0_65] : memref<1x128xf32, #tpu.memory_space<vmem>>, vector<1x128xf32>
    %252 = vector.broadcast %251 : vector<1x128xf32> to vector<16x128xf32>
    %253 = arith.addf %250, %252 : vector<16x128xf32>
    %c0_66 = arith.constant 0 : index
    %c0_67 = arith.constant 0 : index
    %254 = vector.load %arg8[%c0_66, %c0_67] : memref<16x128xf32, #tpu.memory_space<vmem>>, vector<16x128xf32>
    tpu.vector_store %arg8[%c0_66, %c0_67], %253 {strides = array<i32>} : memref<16x128xf32, #tpu.memory_space<vmem>>, vector<16x128xf32>,
    return
  }
}

</mosaic_0001>

<bundles_post_ra>
// kernel: st_encoder_forward.1
= control target key start
LH: loop header
LB: loop body
LE: loop exit
PB: predicated region body
PF: predicated region fallthrough
CT: control target
= control target key end

     0   :  { %vm510_vm0 = vcmask 523264   ;;  %vm1470_vm1 = vcmask 1041408   ;;  %vm1472_vm2 = vcmask 1043456   ;;  %vm1474_vm3 = vcmask 1045504   ;;  %s3036_s1 = inlined_call_operand.vmem [shape: f32[1024,64], index: 1, kind: input, shape index: {}]   ;;  %s3037_s0 = inlined_call_operand.vmem [shape: f32[16,1024], index: 0, kind: input, shape index: {}]   ;;  %s3038_s3 = inlined_call_operand.vmem [shape: f32[64,256], index: 3, kind: input, shape index: {}]   ;;  %s3039_s4 = inlined_call_operand.vmem [shape: f32[64,256], index: 4, kind: input, shape index: {}]   ;;  %s3040_s2 = inlined_call_operand.vmem [shape: f32[1,64], index: 2, kind: input, shape index: {}]   ;;  %s3041_s5 = inlined_call_operand.vmem [shape: f32[1,256], index: 5, kind: input, shape index: {}]   ;;  %s3042_s6 = inlined_call_operand.vmem [shape: f32[128,128], index: 6, kind: input, shape index: {}]   ;;  %s3043_s7 = inlined_call_operand.vmem [shape: f32[1,128], index: 7, kind: input, shape index: {}]   ;;  %s3044_s8 = inlined_call_operand.vmem [shape: f32[16,128], index: 8, kind: output, shape index: {}]  }
   0x1   :  { %v61_v0 = vld [vmem:[%s3036_s1 + $0x80] sm:$0xff]  ;;  %v62_v1 = vld [vmem:[%s3036_s1 + $0x88] sm:$0xff]  ;;  %v63_v11 = vld [vmem:[%s3036_s1 + $0x90] sm:$0xff] }
   0x2   :  { %v45_v2 = vld [vmem:[%s3036_s1] sm:$0xff]  ;;  %v1817_v3 = vpack.c.bf16 %v62_v1, %v61_v0  ;;  %v46_v4 = vld [vmem:[%s3036_s1 + $0x8] sm:$0xff]  ;;  %v64_v13 = vld [vmem:[%s3036_s1 + $0x98] sm:$0xff] }
   0x3   :  { %v93_v5 = vld [vmem:[%s3036_s1 + $0x180] sm:$0xff]  ;;  %v94_v6 = vld [vmem:[%s3036_s1 + $0x188] sm:$0xff]  ;;  %v1819_v7 = vpack.c.bf16 %v46_v4, %v45_v2  ;;  %v47_v14 = vld [vmem:[%s3036_s1 + $0x10] sm:$0xff]  ;;  %v1821_v16 = vpack.c.bf16 %v64_v13, %v63_v11 }
   0x4   :  { %v1849_v8 = vpack.c.bf16 %v94_v6, %v93_v5  ;;  %v77_v9 = vld [vmem:[%s3036_s1 + $0x100] sm:$0xff]  ;;  %v78_v10 = vld [vmem:[%s3036_s1 + $0x108] sm:$0xff]  ;;  %1818 = vmatprep.subr.bf16.mxu0 %v1817_v3  ;;  %v48_v15 = vld [vmem:[%s3036_s1 + $0x18] sm:$0xff] }
   0x5   :  { %v1851_v12 = vpack.c.bf16 %v78_v10, %v77_v9  ;;  %1820 = vmatpush3.bf16.msra.mxu0 %v1819_v7  ;;  %v1823_v17 = vpack.c.bf16 %v48_v15, %v47_v14  ;;  %v95_v18 = vld [vmem:[%s3036_s1 + $0x190] sm:$0xff]  ;;  %v96_v19 = vld [vmem:[%s3036_s1 + $0x198] sm:$0xff]  ;;  %v65_v23 = vld [vmem:[%s3036_s1 + $0xa0] sm:$0xff] }
   0x6   :  { %1850 = vmatprep.subr.bf16.mxu1 %v1849_v8  ;;  %v79_v20 = vld [vmem:[%s3036_s1 + $0x110] sm:$0xff]  ;;  %v1853_v21 = vpack.c.bf16 %v96_v19, %v95_v18  ;;  %v80_v22 = vld [vmem:[%s3036_s1 + $0x118] sm:$0xff]  ;;  %v66_v24 = vld [vmem:[%s3036_s1 + $0xa8] sm:$0xff]  ;;  %1822 = vmatprep.subr.bf16.mxu0 %v1821_v16 }
   0x7   :  { %1852 = vmatpush3.bf16.msra.mxu1 %v1851_v12  ;;  %v1855_v25 = vpack.c.bf16 %v80_v22, %v79_v20  ;;  %v1825_v26 = vpack.c.bf16 %v66_v24, %v65_v23  ;;  %v49_v27 = vld [vmem:[%s3036_s1 + $0x20] sm:$0xff]  ;;  %v50_v28 = vld [vmem:[%s3036_s1 + $0x28] sm:$0xff]  ;;  %v67_v35 = vld [vmem:[%s3036_s1 + $0xb0] sm:$0xff] }
   0x8   :  { %v97_v29 = vld [vmem:[%s3036_s1 + $0x1a0] sm:$0xff]  ;;  %1854 = vmatprep.subr.bf16.mxu1 %v1853_v21  ;;  %v98_v30 = vld [vmem:[%s3036_s1 + $0x1a8] sm:$0xff]  ;;  %v1827_v33 = vpack.c.bf16 %v50_v28, %v49_v27  ;;  %v68_v36 = vld [vmem:[%s3036_s1 + $0xb8] sm:$0xff] }
   0x9   :  { %v81_v31 = vld [vmem:[%s3036_s1 + $0x120] sm:$0xff]  ;;  %v82_v32 = vld [vmem:[%s3036_s1 + $0x128] sm:$0xff]  ;;  %1824 = vmatpush3.bf16.msra.mxu0 %v1823_v17  ;;  %v1857_v34 = vpack.c.bf16 %v98_v30, %v97_v29  ;;  %v51_v37 = vld [vmem:[%s3036_s1 + $0x30] sm:$0xff]  ;;  %v1829_v39 = vpack.c.bf16 %v68_v36, %v67_v35 }
   0xa   :  { %1826 = vmatprep.subr.bf16.mxu0 %v1825_v26  ;;  %v1859_v38 = vpack.c.bf16 %v82_v32, %v81_v31  ;;  %v52_v40 = vld [vmem:[%s3036_s1 + $0x38] sm:$0xff]  ;;  %v99_v41 = vld [vmem:[%s3036_s1 + $0x1b0] sm:$0xff]  ;;  %v69_v46 = vld [vmem:[%s3036_s1 + $0xc0] sm:$0xff] }
   0xb   :  { %1856 = vmatpush3.bf16.msra.mxu1 %v1855_v25  ;;  %v100_v42 = vld [vmem:[%s3036_s1 + $0x1b8] sm:$0xff]  ;;  %v83_v44 = vld [vmem:[%s3036_s1 + $0x130] sm:$0xff]  ;;  %v70_v47 = vld [vmem:[%s3036_s1 + $0xc8] sm:$0xff]  ;;  %v1831_v48 = vpack.c.bf16 %v52_v40, %v51_v37 }
   0xc   :  { %1858 = vmatprep.subr.bf16.mxu1 %v1857_v34  ;;  %v1861_v43 = vpack.c.bf16 %v100_v42, %v99_v41  ;;  %v84_v45 = vld [vmem:[%s3036_s1 + $0x138] sm:$0xff]  ;;  %v101_v49 = vld [vmem:[%s3036_s1 + $0x1c0] sm:$0xff]  ;;  %v102_v50 = vld [vmem:[%s3036_s1 + $0x1c8] sm:$0xff]  ;;  %v1833_v52 = vpack.c.bf16 %v70_v47, %v69_v46 }
   0xd   :  { %1828 = vmatpush3.bf16.msra.mxu0 %v1827_v33  ;;  %v1863_v51 = vpack.c.bf16 %v84_v45, %v83_v44  ;;  %v53_v53 = vld [vmem:[%s3036_s1 + $0x40] sm:$0xff]  ;;  %v54_v54 = vld [vmem:[%s3036_s1 + $0x48] sm:$0xff]  ;;  %v1865_v56 = vpack.c.bf16 %v102_v50, %v101_v49  ;;  %v71_v58 = vld [vmem:[%s3036_s1 + $0xd0] sm:$0xff] }
   0xe   :  { %1830 = vmatprep.subr.bf16.mxu0 %v1829_v39  ;;  %v85_v55 = vld [vmem:[%s3036_s1 + $0x140] sm:$0xff]  ;;  %v86_v57 = vld [vmem:[%s3036_s1 + $0x148] sm:$0xff]  ;;  %v72_v59 = vld [vmem:[%s3036_s1 + $0xd8] sm:$0xff]  ;;  %v1835_v62 = vpack.c.bf16 %v54_v54, %v53_v53 }
   0xf   :  { %1860 = vmatpush3.bf16.msra.mxu1 %v1859_v38  ;;  %v103_v60 = vld [vmem:[%s3036_s1 + $0x1d0] sm:$0xff]  ;;  %v104_v61 = vld [vmem:[%s3036_s1 + $0x1d8] sm:$0xff]  ;;  %v1867_v63 = vpack.c.bf16 %v86_v57, %v85_v55  ;;  %v1837_v0 = vpack.c.bf16 %v72_v59, %v71_v58  ;;  %v73_v6 = vld [vmem:[%s3036_s1 + $0xe0] sm:$0xff] }
  0x10   :  { %1862 = vmatprep.subr.bf16.mxu1 %v1861_v43  ;;  %v55_v1 = vld [vmem:[%s3036_s1 + $0x50] sm:$0xff]  ;;  %v56_v2 = vld [vmem:[%s3036_s1 + $0x58] sm:$0xff]  ;;  %v1869_v4 = vpack.c.bf16 %v104_v61, %v103_v60  ;;  %v74_v7 = vld [vmem:[%s3036_s1 + $0xe8] sm:$0xff] }
  0x11   :  { %1832 = vmatpush3.bf16.msra.mxu0 %v1831_v48  ;;  %v87_v3 = vld [vmem:[%s3036_s1 + $0x150] sm:$0xff]  ;;  %v88_v5 = vld [vmem:[%s3036_s1 + $0x158] sm:$0xff]  ;;  %v105_v8 = vld [vmem:[%s3036_s1 + $0x1e0] sm:$0xff]  ;;  %v1839_v10 = vpack.c.bf16 %v56_v2, %v55_v1  ;;  %v1841_v14 = vpack.c.bf16 %v74_v7, %v73_v6 }
  0x12   :  { %1834 = vmatprep.subr.bf16.mxu0 %v1833_v52  ;;  %v106_v9 = vld [vmem:[%s3036_s1 + $0x1e8] sm:$0xff]  ;;  %v57_v11 = vld [vmem:[%s3036_s1 + $0x60] sm:$0xff]  ;;  %v1871_v13 = vpack.c.bf16 %v88_v5, %v87_v3  ;;  %v75_v19 = vld [vmem:[%s3036_s1 + $0xf0] sm:$0xff] }
  0x13   :  { %1864 = vmatpush3.bf16.msra.mxu1 %v1863_v51  ;;  %v58_v12 = vld [vmem:[%s3036_s1 + $0x68] sm:$0xff]  ;;  %v89_v15 = vld [vmem:[%s3036_s1 + $0x160] sm:$0xff]  ;;  %v1873_v18 = vpack.c.bf16 %v106_v9, %v105_v8  ;;  %v76_v20 = vld [vmem:[%s3036_s1 + $0xf8] sm:$0xff] }
  0x14   :  { %1866 = vmatprep.subr.bf16.mxu1 %v1865_v56  ;;  %v90_v16 = vld [vmem:[%s3036_s1 + $0x168] sm:$0xff]  ;;  %v32_v21 = vld [vmem:[%s3037_s0 + $0x18] sm:$0xff]  ;;  %v107_v22 = vld [vmem:[%s3036_s1 + $0x1f0] sm:$0xff]  ;;  %v1843_v24 = vpack.c.bf16 %v58_v12, %v57_v11  ;;  %v1845_v26 = vpack.c.bf16 %v76_v20, %v75_v19 }
  0x15   :  { %1836 = vmatpush3.bf16.msra.mxu0 %v1835_v62  ;;  %v30_v17 = vld [vmem:[%s3037_s0 + $0x8] sm:$0xff]  ;;  %v108_v23 = vld [vmem:[%s3036_s1 + $0x1f8] sm:$0xff]  ;;  %319 = vmatprep.mubr.f32.mxu1 %v32_v21  ;;  %v1875_v25 = vpack.c.bf16 %v90_v16, %v89_v15  ;;  %v59_v27 = vld [vmem:[%s3036_s1 + $0x70] sm:$0xff] }
  0x16   :  { %1838 = vmatprep.subr.bf16.mxu0 %v1837_v0  ;;  %244 = vmatprep.mubr.f32.mxu0 %v30_v17  ;;  %v60_v28 = vld [vmem:[%s3036_s1 + $0x78] sm:$0xff]  ;;  %v91_v29 = vld [vmem:[%s3036_s1 + $0x170] sm:$0xff]  ;;  %v1877_v30 = vpack.c.bf16 %v108_v23, %v107_v22  ;;  %v125_v32 = vld [vmem:[%s3036_s1 + $0x280] sm:$0xff] }
  0x17   :  { %1868 = vmatpush3.bf16.msra.mxu1 %v1867_v63  ;;  %v92_v31 = vld [vmem:[%s3036_s1 + $0x178] sm:$0xff]  ;;  %v126_v33 = vld [vmem:[%s3036_s1 + $0x288] sm:$0xff]  ;;  %v157_v34 = vld [vmem:[%s3036_s1 + $0x380] sm:$0xff]  ;;  %v1847_v36 = vpack.c.bf16 %v60_v28, %v59_v27 }
  0x18   :  { %1870 = vmatprep.subr.bf16.mxu1 %v1869_v4  ;;  %v158_v35 = vld [vmem:[%s3036_s1 + $0x388] sm:$0xff]  ;;  %v1879_v37 = vpack.c.bf16 %v92_v31, %v91_v29  ;;  %v1881_v38 = vpack.c.bf16 %v126_v33, %v125_v32  ;;  %v109_v39 = vld [vmem:[%s3036_s1 + $0x200] sm:$0xff]  ;;  %v127_v44 = vld [vmem:[%s3036_s1 + $0x290] sm:$0xff] }
  0x19   :  { %1840 = vmatpush3.bf16.msra.mxu0 %v1839_v10  ;;  %v110_v40 = vld [vmem:[%s3036_s1 + $0x208] sm:$0xff]  ;;  %v141_v41 = vld [vmem:[%s3036_s1 + $0x300] sm:$0xff]  ;;  %v1913_v42 = vpack.c.bf16 %v158_v35, %v157_v34  ;;  %v128_v45 = vld [vmem:[%s3036_s1 + $0x298] sm:$0xff] }
  0x1a   :  { %1842 = vmatprep.subr.bf16.mxu0 %v1841_v14  ;;  %v142_v43 = vld [vmem:[%s3036_s1 + $0x308] sm:$0xff]  ;;  %v159_v46 = vld [vmem:[%s3036_s1 + $0x390] sm:$0xff]  ;;  %v160_v47 = vld [vmem:[%s3036_s1 + $0x398] sm:$0xff]  ;;  %v1883_v49 = vpack.c.bf16 %v110_v40, %v109_v39  ;;  %v1885_v52 = vpack.c.bf16 %v128_v45, %v127_v44 }
  0x1b   :  { %1872 = vmatpush3.bf16.msra.mxu1 %v1871_v13  ;;  %v29_v48 = vld [vmem:[%s3037_s0] sm:$0xff]  ;;  %v31_v50 = vld [vmem:[%s3037_s0 + $0x10] sm:$0xff]  ;;  %v1915_v51 = vpack.c.bf16 %v142_v43, %v141_v41  ;;  %v112_v54 = vld [vmem:[%s3036_s1 + $0x218] sm:$0xff]  ;;  %v1917_v56 = vpack.c.bf16 %v160_v47, %v159_v46 }
  0x1c   :  { %1874 = vmatprep.subr.bf16.mxu1 %v1873_v18  ;;  %v111_v53 = vld [vmem:[%s3036_s1 + $0x210] sm:$0xff]  ;;  %v144_v57 = vld [vmem:[%s3036_s1 + $0x318] sm:$0xff]  ;;  %v129_v58 = vld [vmem:[%s3036_s1 + $0x2a0] sm:$0xff] }
  0x1d   :  { %1844 = vmatpush3.bf16.msra.mxu0 %v1843_v24  ;;  %v143_v55 = vld [vmem:[%s3036_s1 + $0x310] sm:$0xff]  ;;  %v130_v59 = vld [vmem:[%s3036_s1 + $0x2a8] sm:$0xff]  ;;  %v161_v60 = vld [vmem:[%s3036_s1 + $0x3a0] sm:$0xff]  ;;  %v1887_v62 = vpack.c.bf16 %v112_v54, %v111_v53 }
  0x1e   :  { %1846 = vmatprep.subr.bf16.mxu0 %v1845_v26  ;;  %v162_v61 = vld [vmem:[%s3036_s1 + $0x3a8] sm:$0xff]  ;;  %v1919_v63 = vpack.c.bf16 %v144_v57, %v143_v55  ;;  %v1889_v0 = vpack.c.bf16 %v130_v59, %v129_v58  ;;  %v113_v1 = vld [vmem:[%s3036_s1 + $0x220] sm:$0xff]  ;;  %v131_v6 = vld [vmem:[%s3036_s1 + $0x2b0] sm:$0xff] }
  0x1f   :  { %1876 = vmatpush3.bf16.msra.mxu1 %v1875_v25  ;;  %v114_v2 = vld [vmem:[%s3036_s1 + $0x228] sm:$0xff]  ;;  %v145_v3 = vld [vmem:[%s3036_s1 + $0x320] sm:$0xff]  ;;  %v1921_v4 = vpack.c.bf16 %v162_v61, %v161_v60  ;;  %v132_v7 = vld [vmem:[%s3036_s1 + $0x2b8] sm:$0xff] }
  0x20   :  { %1878 = vmatprep.subr.bf16.mxu1 %v1877_v30  ;;  %v146_v5 = vld [vmem:[%s3036_s1 + $0x328] sm:$0xff]  ;;  %v163_v8 = vld [vmem:[%s3036_s1 + $0x3b0] sm:$0xff]  ;;  %v164_v9 = vld [vmem:[%s3036_s1 + $0x3b8] sm:$0xff]  ;;  %v1891_v10 = vpack.c.bf16 %v114_v2, %v113_v1  ;;  %v1893_v15 = vpack.c.bf16 %v132_v7, %v131_v6 }
  0x21   :  { %1848 = vmatpush3.bf16.msra.mxu0 %v1847_v36  ;;  %v115_v11 = vld [vmem:[%s3036_s1 + $0x230] sm:$0xff]  ;;  %v116_v12 = vld [vmem:[%s3036_s1 + $0x238] sm:$0xff]  ;;  %v38_v13 = vld [vmem:[%s3037_s0 + $0x48] sm:$0xff]  ;;  %v1923_v14 = vpack.c.bf16 %v146_v5, %v145_v3  ;;  %v1925_v19 = vpack.c.bf16 %v164_v9, %v163_v8 }
  0x22   :  { %1882 = vmatprep.subr.bf16.mxu0 %v1881_v38  ;;  %v147_v16 = vld [vmem:[%s3036_s1 + $0x330] sm:$0xff]  ;;  %v148_v17 = vld [vmem:[%s3036_s1 + $0x338] sm:$0xff]  ;;  %v37_v18 = vld [vmem:[%s3037_s0 + $0x40] sm:$0xff]  ;;  %v1895_v26 = vpack.c.bf16 %v116_v12, %v115_v11 }
  0x23   :  { %1880 = vmatpush3.bf16.msra.mxu1 %v1879_v37  ;;  %v133_v20 = vld [vmem:[%s3036_s1 + $0x2c0] sm:$0xff]  ;;  %v134_v21 = vld [vmem:[%s3036_s1 + $0x2c8] sm:$0xff]  ;;  %v40_v22 = vld [vmem:[%s3037_s0 + $0x58] sm:$0xff]  ;;  %v1927_v29 = vpack.c.bf16 %v148_v17, %v147_v16 }
  0x24   :  { %1914 = vmatprep.subr.bf16.mxu1 %v1913_v42  ;;  %245 = vmatmul.mubr.f32.vlgmr.msra.gmra.mrb[0].mxu0 %v29_v48  ;;  %v165_v23 = vld [vmem:[%s3036_s1 + $0x3c0] sm:$0xff]  ;;  %v166_v24 = vld [vmem:[%s3036_s1 + $0x3c8] sm:$0xff]  ;;  %v39_v25 = vld [vmem:[%s3037_s0 + $0x50] sm:$0xff]  ;;  %v1897_v30 = vpack.c.bf16 %v134_v21, %v133_v20 }
  0x25   :  { %1884 = vmatpush3.bf16.msra.mxu0 %v1883_v49  ;;  %249 = vmatprep.mubr.f32.mxu0 %v38_v13  ;;  %v117_v27 = vld [vmem:[%s3036_s1 + $0x240] sm:$0xff]  ;;  %v118_v28 = vld [vmem:[%s3036_s1 + $0x248] sm:$0xff]  ;;  %v1929_v34 = vpack.c.bf16 %v166_v24, %v165_v23  ;;  %v135_v35 = vld [vmem:[%s3036_s1 + $0x2d0] sm:$0xff] }
  0x26   :  { %320 = vmatmul.mubr.f32.vlgmr.msra.gmra.mrb[0].mxu1 %v31_v50  ;;  %1886 = vmatprep.subr.bf16.mxu0 %v1885_v52  ;;  %v149_v31 = vld [vmem:[%s3036_s1 + $0x340] sm:$0xff]  ;;  %v150_v32 = vld [vmem:[%s3036_s1 + $0x348] sm:$0xff]  ;;  %v136_v36 = vld [vmem:[%s3036_s1 + $0x2d8] sm:$0xff]  ;;  %v1899_v40 = vpack.c.bf16 %v118_v28, %v117_v27 }
  0x27   :  { %1916 = vmatpush3.bf16.msra.mxu1 %v1915_v51  ;;  %324 = vmatprep.mubr.f32.mxu1 %v40_v22  ;;  %v34_v33 = vld [vmem:[%s3037_s0 + $0x28] sm:$0xff]  ;;  %v36_v37 = vld [vmem:[%s3037_s0 + $0x38] sm:$0xff]  ;;  %v167_v38 = vld [vmem:[%s3036_s1 + $0x3d0] sm:$0xff]  ;;  %v1931_v41 = vpack.c.bf16 %v150_v32, %v149_v31  ;;  %v1901_v42 = vpack.c.bf16 %v136_v36, %v135_v35 }
  0x28   :  { %1918 = vmatprep.subr.bf16.mxu1 %v1917_v56  ;;  %250 = vmatmul.mubr.f32.gmra.mrb[2].mxu0 %v37_v18  ;;  %v168_v39 = vld [vmem:[%s3036_s1 + $0x3d8] sm:$0xff]  ;;  %v119_v43 = vld [vmem:[%s3036_s1 + $0x250] sm:$0xff]  ;;  %v137_v48 = vld [vmem:[%s3036_s1 + $0x2e0] sm:$0xff] }
  0x29   :  { %1888 = vmatpush3.bf16.msra.mxu0 %v1887_v62  ;;  %394 = vmatprep.mubr.f32.mxu0 %v34_v33  ;;  %v120_v44 = vld [vmem:[%s3036_s1 + $0x258] sm:$0xff]  ;;  %v151_v45 = vld [vmem:[%s3036_s1 + $0x350] sm:$0xff]  ;;  %v1933_v46 = vpack.c.bf16 %v168_v39, %v167_v38  ;;  %v138_v49 = vld [vmem:[%s3036_s1 + $0x2e8] sm:$0xff] }
  0x2a   :  { %1890 = vmatprep.subr.bf16.mxu0 %v1889_v0  ;;  %325 = vmatmul.mubr.f32.gmra.mrb[2].mxu1 %v39_v25  ;;  %v152_v47 = vld [vmem:[%s3036_s1 + $0x358] sm:$0xff]  ;;  %v169_v50 = vld [vmem:[%s3036_s1 + $0x3e0] sm:$0xff]  ;;  %v170_v51 = vld [vmem:[%s3036_s1 + $0x3e8] sm:$0xff]  ;;  %v1903_v52 = vpack.c.bf16 %v120_v44, %v119_v43  ;;  %v1905_v54 = vpack.c.bf16 %v138_v49, %v137_v48 }
  0x2b   :  { %1920 = vmatpush3.bf16.msra.mxu1 %v1919_v63  ;;  %469 = vmatprep.mubr.f32.mxu1 %v36_v37  ;;  %v1935_v53 = vpack.c.bf16 %v152_v47, %v151_v45  ;;  %v121_v55 = vld [vmem:[%s3036_s1 + $0x260] sm:$0xff]  ;;  %v122_v56 = vld [vmem:[%s3036_s1 + $0x268] sm:$0xff]  ;;  %v1937_v58 = vpack.c.bf16 %v170_v51, %v169_v50  ;;  %v139_v60 = vld [vmem:[%s3036_s1 + $0x2f0] sm:$0xff] }
  0x2c   :  { %1922 = vmatprep.subr.bf16.mxu1 %v1921_v4  ;;  %v153_v57 = vld [vmem:[%s3036_s1 + $0x360] sm:$0xff]  ;;  %v154_v59 = vld [vmem:[%s3036_s1 + $0x368] sm:$0xff]  ;;  %v140_v61 = vld [vmem:[%s3036_s1 + $0x2f8] sm:$0xff]  ;;  %v1907_v0 = vpack.c.bf16 %v122_v56, %v121_v55 }
  0x2d   :  { %1892 = vmatpush3.bf16.msra.mxu0 %v1891_v10  ;;  %v171_v62 = vld [vmem:[%s3036_s1 + $0x3f0] sm:$0xff]  ;;  %v172_v63 = vld [vmem:[%s3036_s1 + $0x3f8] sm:$0xff]  ;;  %v1939_v1 = vpack.c.bf16 %v154_v59, %v153_v57  ;;  %v1909_v2 = vpack.c.bf16 %v140_v61, %v139_v60  ;;  %v33_v10 = vld [vmem:[%s3037_s0 + $0x20] sm:$0xff] }
  0x2e   :  { %1894 = vmatprep.subr.bf16.mxu0 %v1893_v15  ;;  %v123_v3 = vld [vmem:[%s3036_s1 + $0x270] sm:$0xff]  ;;  %v124_v4 = vld [vmem:[%s3036_s1 + $0x278] sm:$0xff]  ;;  %v1941_v5 = vpack.c.bf16 %v172_v63, %v171_v62  ;;  %v42_v12 = vld [vmem:[%s3037_s0 + $0x68] sm:$0xff] }
  0x2f   :  { %1924 = vmatpush3.bf16.msra.mxu1 %v1923_v14  ;;  %v155_v6 = vld [vmem:[%s3036_s1 + $0x370] sm:$0xff]  ;;  %v156_v7 = vld [vmem:[%s3036_s1 + $0x378] sm:$0xff]  ;;  %v1911_v8 = vpack.c.bf16 %v124_v4, %v123_v3  ;;  %v41_v14 = vld [vmem:[%s3037_s0 + $0x60] sm:$0xff] }
  0x30   :  { %1926 = vmatprep.subr.bf16.mxu1 %v1925_v19  ;;  %v1943_v9 = vpack.c.bf16 %v156_v7, %v155_v6  ;;  %v35_v11 = vld [vmem:[%s3037_s0 + $0x30] sm:$0xff]  ;;  %v44_v13 = vld [vmem:[%s3037_s0 + $0x78] sm:$0xff]  ;;  %v483_v16 = vld [vmem:[%s3038_s3 + $0x8] sm:$0xff] }
  0x31   :  { %1896 = vmatpush3.bf16.msra.mxu0 %v1895_v26  ;;  %v43_v15 = vld [vmem:[%s3037_s0 + $0x70] sm:$0xff]  ;;  %v485_v17 = vld [vmem:[%s3038_s3 + $0x18] sm:$0xff]  ;;  %v482_v19 = vld [vmem:[%s3038_s3] sm:$0xff] }
  0x32   :  { %1898 = vmatprep.subr.bf16.mxu0 %v1897_v30  ;;  %v1945_v18 = vpack.c.bf16 %v485_v17, %v483_v16  ;;  %v484_v20 = vld [vmem:[%s3038_s3 + $0x10] sm:$0xff]  ;;  %v595_v22 = vld [vmem:[%s3039_s4 + $0x8] sm:$0xff]  ;;  %v597_v23 = vld [vmem:[%s3039_s4 + $0x18] sm:$0xff] }
  0x33   :  { %1928 = vmatpush3.bf16.msra.mxu1 %v1927_v29  ;;  %v1947_v21 = vpack.c.bf16 %v484_v20, %v482_v19  ;;  %v2716_v24 = vpack.c.bf16 %v597_v23, %v595_v22  ;;  %v594_v25 = vld [vmem:[%s3039_s4] sm:$0xff]  ;;  %v596_v26 = vld [vmem:[%s3039_s4 + $0x10] sm:$0xff]  ;;  %v487_v28 = vld [vmem:[%s3038_s3 + $0x28] sm:$0xff] }
  0x34   :  { %1930 = vmatprep.subr.bf16.mxu1 %v1929_v34  ;;  %v2725_v27 = vpack.c.bf16 %v596_v26, %v594_v25  ;;  %v489_v29 = vld [vmem:[%s3038_s3 + $0x38] sm:$0xff]  ;;  %v486_v30 = vld [vmem:[%s3038_s3 + $0x20] sm:$0xff]  ;;  %v488_v32 = vld [vmem:[%s3038_s3 + $0x30] sm:$0xff] }
  0x35   :  { %1900 = vmatpush3.bf16.msra.mxu0 %v1899_v40  ;;  %v1949_v31 = vpack.c.bf16 %v489_v29, %v487_v28  ;;  %v599_v33 = vld [vmem:[%s3039_s4 + $0x28] sm:$0xff]  ;;  %v601_v34 = vld [vmem:[%s3039_s4 + $0x38] sm:$0xff]  ;;  %v1951_v35 = vpack.c.bf16 %v488_v32, %v486_v30  ;;  %v598_v37 = vld [vmem:[%s3039_s4 + $0x20] sm:$0xff] }
  0x36   :  { %1902 = vmatprep.subr.bf16.mxu0 %v1901_v42  ;;  %v2746_v36 = vpack.c.bf16 %v601_v34, %v599_v33  ;;  %v600_v38 = vld [vmem:[%s3039_s4 + $0x30] sm:$0xff]  ;;  %v491_v40 = vld [vmem:[%s3038_s3 + $0x48] sm:$0xff]  ;;  %v490_v43 = vld [vmem:[%s3038_s3 + $0x40] sm:$0xff] }
  0x37   :  { %1932 = vmatpush3.bf16.msra.mxu1 %v1931_v41  ;;  %v2755_v39 = vpack.c.bf16 %v600_v38, %v598_v37  ;;  %v493_v41 = vld [vmem:[%s3038_s3 + $0x58] sm:$0xff]  ;;  %v492_v44 = vld [vmem:[%s3038_s3 + $0x50] sm:$0xff]  ;;  %v603_v45 = vld [vmem:[%s3039_s4 + $0x48] sm:$0xff] }
  0x38   :  { %1934 = vmatprep.subr.bf16.mxu1 %v1933_v46  ;;  %v1953_v42 = vpack.c.bf16 %v493_v41, %v491_v40  ;;  %v1955_v46 = vpack.c.bf16 %v492_v44, %v490_v43  ;;  %v605_v47 = vld [vmem:[%s3039_s4 + $0x58] sm:$0xff]  ;;  %v602_v48 = vld [vmem:[%s3039_s4 + $0x40] sm:$0xff]  ;;  %v604_v49 = vld [vmem:[%s3039_s4 + $0x50] sm:$0xff] }
  0x39   :  { %1904 = vmatpush3.bf16.msra.mxu0 %v1903_v52  ;;  %v2782_v50 = vpack.c.bf16 %v605_v47, %v603_v45  ;;  %v2784_v51 = vpack.c.bf16 %v604_v49, %v602_v48  ;;  %v495_v52 = vld [vmem:[%s3038_s3 + $0x68] sm:$0xff]  ;;  %v494_v55 = vld [vmem:[%s3038_s3 + $0x60] sm:$0xff]  ;;  %v496_v56 = vld [vmem:[%s3038_s3 + $0x70] sm:$0xff] }
  0x3a   :  { %1906 = vmatprep.subr.bf16.mxu0 %v1905_v54  ;;  %v607_v57 = vld [vmem:[%s3039_s4 + $0x68] sm:$0xff]  ;;  %v609_v59 = vld [vmem:[%s3039_s4 + $0x78] sm:$0xff]  ;;  %v606_v60 = vld [vmem:[%s3039_s4 + $0x60] sm:$0xff] }
  0x3b   :  { %1936 = vmatpush3.bf16.msra.mxu1 %v1935_v53  ;;  %v497_v53 = vld [vmem:[%s3038_s3 + $0x78] sm:$0xff]  ;;  %v608_v61 = vld [vmem:[%s3039_s4 + $0x70] sm:$0xff]  ;;  %v2812_v62 = vpack.c.bf16 %v609_v59, %v607_v57  ;;  %v498_v45 = vld [vmem:[%s3041_s5] sm:$0x3]  ;;  %s2220_s5 = smov 64  }
  0x3c   :  { %1938 = vmatprep.subr.bf16.mxu1 %v1937_v58  ;;  %v1957_v54 = vpack.c.bf16 %v497_v53, %v495_v52  ;;  %v1959_v58 = vpack.c.bf16 %v496_v56, %v494_v55  ;;  %v2814_v63 = vpack.c.bf16 %v608_v61, %v606_v60 }
  0x3d   :  { %1908 = vmatpush3.bf16.msra.mxu0 %v1907_v0  ;;  %v2219_v0 = vmov 0.0  }
  0x3e   :  { %1910 = vmatprep.subr.bf16.mxu0 %v1909_v2  ;;  %v1585_v2 = vld [vmem:[%s3040_s2] ss:$0 sm:$0xff] }
  0x3f   :  { %1940 = vmatpush3.bf16.msra.mxu1 %v1939_v1 }
  0x40   :  { %1942 = vmatprep.subr.bf16.mxu1 %v1941_v5 }
  0x41   :  { %1912 = vmatpush3.bf16.msra.mxu0 %v1911_v8 }
  0x42   :  { %1946 = vmatprep.subr.bf16.mxu0 %v1945_v18 }
  0x43   :  { %1944 = vmatpush3.bf16.msra.mxu1 %v1943_v9 }
  0x44   :  { %395 = vmatmul.mubr.f32.vlgmr.msra.gmra.mrb[4].mxu0 %v33_v10  ;;  %1962 = vmatprep.subr.bf16.mxu1 %v2716_v24 }
  0x45   :  { %399 = vmatprep.mubr.f32.mxu0 %v42_v12  ;;  %1948 = vmatpush1.bf16.msra.mxu0 %v1947_v21 }
  0x46   :  { %470 = vmatmul.mubr.f32.vlgmr.msra.gmra.mrb[4].mxu1 %v35_v11  ;;  %1950 = vmatprep.subr.bf16.mxu0 %v1949_v31 }
  0x47   :  { %474 = vmatprep.mubr.f32.mxu1 %v44_v13  ;;  %1964 = vmatpush1.bf16.msra.mxu1 %v2725_v27 }
  0x48   :  { %400 = vmatmul.mubr.f32.gmra.mrb[6].mxu0 %v41_v14  ;;  %1966 = vmatprep.subr.bf16.mxu1 %v2746_v36 }
  0x49   :  { %1952 = vmatpush1.bf16.msra.mxu0 %v1951_v35  ;;  %581 = vmatprep.mubr.f32.mxu0 %v2219_v0 }
  0x4a   :  { %475 = vmatmul.mubr.f32.gmra.mrb[6].mxu1 %v43_v15  ;;  %1954 = vmatprep.subr.bf16.mxu0 %v1953_v42  ;;  %v500_v42 = vlaneseq }
  0x4b   :  { %1968 = vmatpush1.bf16.msra.mxu1 %v2755_v39  ;;  %677 = vmatprep.mubr.f32.mxu1 %v2219_v0 }
  0x4c   :  { %1970 = vmatprep.subr.bf16.mxu1 %v2782_v50  ;;  %v501_v43 = vshrl.u32 %v500_v42, 7 }
  0x4d   :  { %1956 = vmatpush1.bf16.msra.mxu0 %v1955_v46 }
  0x4e   :  { %1958 = vmatprep.subr.bf16.mxu0 %v1957_v54  ;;  %v502_v44 = vsub.s32 0, %v501_v43  ;;  %v506_v48 = vsub.s32 1, %v501_v43 }
  0x4f   :  { %1972 = vmatpush1.bf16.msra.mxu1 %v2784_v51 }
  0x50   :  { %1974 = vmatprep.subr.bf16.mxu1 %v2812_v62  ;;  %v503_v46 = vrot.slane %v498_v45, %v502_v44  ;;  %v507_v54 = vrot.slane %v498_v45, %v506_v48 }
  0x51   :  { %1960 = vmatpush1.bf16.msra.mxu0 %v1959_v58 }
  0x52   :  { %1978 = vmatprep.subr.bf16.mxu0 %v2716_v24 }
  0x53   :  { %1976 = vmatpush1.bf16.msra.mxu1 %v2814_v63 }
  0x54   :  { %1994 = vmatprep.subr.bf16.mxu1 %v2716_v24 }
  0x56   :  { %678 = vmatmul.mubr.f32.vlgmr.msra.gmra.mrb[8].mxu1 %v2219_v0 }
  0x57   :  { %1996 = vmatpush1.bf16.msra.mxu1 %v2725_v27  ;;  %887 = vmatprep.mubr.f32.mxu1 %v2219_v0 }
  0x58   :  { %1998 = vmatprep.subr.bf16.mxu1 %v2746_v36 }
  0x5b   :  { %2000 = vmatpush1.bf16.msra.mxu1 %v2755_v39 }
  0x5c   :  { %2002 = vmatprep.subr.bf16.mxu1 %v2782_v50 }
  0x5f   :  { %2004 = vmatpush1.bf16.msra.mxu1 %v2784_v51 }
  0x60   :  { %2006 = vmatprep.subr.bf16.mxu1 %v2812_v62 }
  0x63   :  { %2008 = vmatpush1.bf16.msra.mxu1 %v2814_v63 }
  0x64   :  { %2026 = vmatprep.subr.bf16.mxu1 %v2716_v24 }
  0xf7   :  { %v1644_v1 = vpop.f32.mrb[0].mxu0 }
  0xf8   :  { %v1645_v3 = vpop.f32.mrb[1].mxu0 }
  0xf9   :  { %v1682_v4 = vpop.f32.mrb[0].mxu1  ;;  %v1646_v5 = vadd.f32 %v1645_v3, %v1644_v1 }
  0xfa   :  { %v1683_v6 = vpop.f32.mrb[1].mxu1 }
  0xfb   :  { %v1684_v7 = vadd.f32 %v1683_v6, %v1682_v4  ;;  %v247_v8 = vadd.f32 %v1646_v5, %v1585_v2  ;;  %v1647_v10 = vpop.f32.mrb[2].mxu0 }
  0xfc   :  { %v1648_v11 = vpop.f32.mrb[3].mxu0 }
  0xfd   :  { %v322_v9 = vadd.f32 %v1684_v7, %v247_v8  ;;  %v1685_v12 = vpop.f32.mrb[2].mxu1  ;;  %v1649_v13 = vadd.f32 %v1648_v11, %v1647_v10 }
  0xfe   :  { %v1686_v14 = vpop.f32.mrb[3].mxu1 }
  0xff   :  { %v1687_v15 = vadd.f32 %v1686_v14, %v1685_v12  ;;  %v252_v16 = vadd.f32 %v1649_v13, %v1585_v2 }
 0x101   :  { %v327_v17 = vadd.f32 %v1687_v15, %v252_v16 }
 0x117   :  { %v1720_v18 = vpop.f32.mrb[4].mxu0 }
 0x118   :  { %v1721_v19 = vpop.f32.mrb[5].mxu0 }
 0x119   :  { %v1758_v20 = vpop.f32.mrb[4].mxu1  ;;  %v1722_v21 = vadd.f32 %v1721_v19, %v1720_v18 }
 0x11a   :  { %v1759_v22 = vpop.f32.mrb[5].mxu1 }
 0x11b   :  { %v1760_v23 = vadd.f32 %v1759_v22, %v1758_v20  ;;  %v397_v25 = vadd.f32 %v1722_v21, %v322_v9  ;;  %v1723_v26 = vpop.f32.mrb[6].mxu0 }
 0x11c   :  { %v1724_v28 = vpop.f32.mrb[7].mxu0 }
 0x11d   :  { %v1761_v29 = vpop.f32.mrb[6].mxu1  ;;  %v2835_v30 = vadd.f32 %v1760_v23, %v397_v25  ;;  %v1725_v31 = vadd.f32 %v1724_v28, %v1723_v26 }
 0x11e   :  { %v1762_v32 = vpop.f32.mrb[7].mxu1 }
 0x11f   :  { %v1763_v33 = vadd.f32 %v1762_v32, %v1761_v29  ;;  %v480_v34 = vmax.f32 %v2835_v30, 0.0  ;;  %v402_v35 = vadd.f32 %v1725_v31, %v327_v17 }
 0x121   :  { %v2838_v37 = vadd.f32 %v1763_v33, %v402_v35  ;;  %1586 = vmatmul.mubr.msk.f32.vlgmr.msra.gmra.mrb[8].mxu0 %vm510_vm0, %v480_v34 }
 0x122   :  { %587 = vmatprep.mubr.f32.mxu0 %v2219_v0  ;;  %1980 = vmatpush1.bf16.msra.mxu0 %v2725_v27 }
 0x123   :  { %v481_v38 = vmax.f32 %v2838_v37, 0.0  ;;  %1982 = vmatprep.subr.bf16.mxu0 %v2746_v36 }
 0x125   :  { %1587 = vmatmul.mubr.msk.f32.gmra.mrb[10].mxu0 %vm510_vm0, %v481_v38 }
 0x126   :  { %1984 = vmatpush1.bf16.msra.mxu0 %v2755_v39  ;;  %777 = vmatprep.mubr.f32.mxu0 %v2219_v0 }
 0x127   :  { %1986 = vmatprep.subr.bf16.mxu0 %v2782_v50 }
 0x129   :  { %v679_v40 = vpop.f32.mrb[8].mxu1 }
 0x12a   :  { %1988 = vmatpush1.bf16.msra.mxu0 %v2784_v51  ;;  %v681_v41 = vpop.f32.mrb[9].mxu1 }
 0x12b   :  { %1990 = vmatprep.subr.bf16.mxu0 %v2812_v62 }
 0x12e   :  { %1992 = vmatpush1.bf16.msra.mxu0 %v2814_v63 }
 0x12f   :  { %2010 = vmatprep.subr.bf16.mxu0 %v2716_v24 }
 0x1f4   :  { %v583_v47 = vpop.f32.mrb[8].mxu0 }
 0x1f5   :  { %v2860_v49 = vadd.f32 %v583_v47, %v503_v46  ;;  %v585_v52 = vpop.f32.mrb[9].mxu0 }
 0x1f6   :  { %v2867_v60 = vadd.f32 %v585_v52, %v507_v54 }
 0x1f7   :  { %v684_v53 = vadd.f32 %v679_v40, %v2860_v49 }
 0x1f8   :  { %v589_v55 = vpop.f32.mrb[10].mxu0  ;;  %v685_v61 = vadd.f32 %v681_v41, %v2867_v60 }
 0x1f9   :  { %v1588_v56 = vmul.f32 -1.442695, %v684_v53  ;;  %v2863_v57 = vadd.f32 %v589_v55, %v503_v46  ;;  %v591_v58 = vpop.f32.mrb[11].mxu0 }
 0x1fa   :  { %v2865_v59 = vadd.f32 %v591_v58, %v507_v54  ;;  %v1589_v6 = vmul.f32 -1.442695, %v685_v61 }
 0x1fb   :  { %2123 = vpow2.f32 %v1588_v56 }
 0x1fc   :  { %2125 = vtanh.f32 %v685_v61 }
 0x205   :  { %v2124_v1 = vpop.eup %2123 }
 0x206   :  { %v689_v2 = vadd.f32 1.0, %v2124_v1  ;;  %v2126_v3 = vpop.eup %2125 }
 0x208   :  { %2127 = vrcp.f32 %v689_v2 }
 0x209   :  { %2129 = vpow2.f32 %v1589_v6 }
 0x212   :  { %v2128_v4 = vpop.eup %2127 }
 0x213   :  { %v700_v5 = vmul.f32 %v2128_v4, %v2126_v3  ;;  %v2130_v7 = vpop.eup %2129  ;;  %v699_v9 = vmul.f32 0.0, %v2128_v4 }
 0x214   :  { %v696_v8 = vadd.f32 1.0, %v2130_v7 }
 0x215   :  { %702 = vrot.lane.b32.xlu0 %v700_v5, %s2220_s5 }
 0x216   :  { %2131 = vrcp.f32 %v696_v8 }
 0x220   :  { %v2132_v12 = vpop.eup %2131 }
 0x287   :  { %v703_v10 = vpop.permute.xlu0 %702 }
 0x288   :  { %v705_v11 = vadd.f32 %v703_v10, %v699_v9 }
 0x28a   :  { %2133 = vtanh.f32 %v705_v11  ;;  %v806_v28 = vrot.slane %v705_v11, 6 }
 0x294   :  { %v2134_v13 = vpop.eup %2133 }
 0x295   :  { %v2871_v14 = vmul.f32 %v2134_v13, %v2132_v12 }
 0x297   :  { %709 = vrot.lane.b32.xlu0 %v2871_v14, %s2220_s5 }
 0x309   :  { %v710_v15 = vpop.permute.xlu0 %709 }
 0x30a   :  { %1590 = vmatmul.mubr.msk.f32.vlgmr.msra.gmra.mrb[12].mxu0 %vm510_vm0, %v710_v15 }
 0x30b   :  { %2012 = vmatpush1.bf16.msra.mxu0 %v2725_v27  ;;  %997 = vmatprep.mubr.f32.mxu0 %v2219_v0 }
 0x30c   :  { %2014 = vmatprep.subr.bf16.mxu0 %v2746_v36 }
 0x30f   :  { %2016 = vmatpush1.bf16.msra.mxu0 %v2755_v39 }
 0x310   :  { %2018 = vmatprep.subr.bf16.mxu0 %v2782_v50 }
 0x313   :  { %2020 = vmatpush1.bf16.msra.mxu0 %v2784_v51 }
 0x314   :  { %2022 = vmatprep.subr.bf16.mxu0 %v2812_v62 }
 0x317   :  { %2024 = vmatpush1.bf16.msra.mxu0 %v2814_v63 }
 0x318   :  { %2042 = vmatprep.subr.bf16.mxu0 %v2716_v24 }
 0x3dd   :  { %v779_v16 = vpop.f32.mrb[12].mxu0 }
 0x3de   :  { %v786_v17 = vrot.slane %v779_v16, 6  ;;  %v781_v18 = vpop.f32.mrb[13].mxu0 }
 0x3df   :  { %v787_v21 = vrot.slane %v781_v18, 6 }
 0x3e0   :  { %v790_v19 = vadd.f32 %v786_v17, %v2860_v49 }
 0x3e1   :  { %v791_v22 = vadd.f32 %v787_v21, %v2867_v60 }
 0x3e2   :  { %v1591_v20 = vmul.f32 -1.442695, %v790_v19 }
 0x3e3   :  { %v1592_v33 = vmul.f32 -1.442695, %v791_v22 }
 0x3e4   :  { %2135 = vpow2.f32 %v1591_v20 }
 0x3e5   :  { %2137 = vtanh.f32 %v791_v22 }
 0x3ee   :  { %v2136_v23 = vpop.eup %2135 }
 0x3ef   :  { %v795_v25 = vadd.f32 1.0, %v2136_v23  ;;  %v2138_v26 = vpop.eup %2137 }
 0x3f1   :  { %2139 = vrcp.f32 %v795_v25 }
 0x3f2   :  { %2141 = vpow2.f32 %v1592_v33 }
 0x3fb   :  { %v2140_v29 = vpop.eup %2139 }
 0x3fc   :  { %v809_v31 = vmul.f32 %v2140_v29, %v2138_v26  ;;  %v808_v32 = vmul.f32 %v2140_v29, %v806_v28  ;;  %v2142_v35 = vpop.eup %2141 }
 0x3fd   :  { %v802_v40 = vadd.f32 1.0, %v2142_v35 }
 0x3fe   :  { %811 = vrot.lane.b32.xlu1 %v809_v31, %s2220_s5 }
 0x3ff   :  { %2143 = vrcp.f32 %v802_v40 }
 0x409   :  { %v2144_v43 = vpop.eup %2143 }
 0x470   :  { %v812_v41 = vpop.permute.xlu1 %811 }
 0x471   :  { %v814_v42 = vadd.f32 %v812_v41, %v808_v32 }
 0x473   :  { %2145 = vtanh.f32 %v814_v42  ;;  %v916_v3 = vrot.slane %v814_v42, 6 }
 0x47d   :  { %v2146_v44 = vpop.eup %2145 }
 0x47e   :  { %v816_v45 = vmul.f32 %v2146_v44, %v2144_v43 }
 0x480   :  { %v818_v46 = vrot.slane %v816_v45, 2  ;;  %v1471_v16 = vsel %vm1470_vm1, %v2871_v14, %v816_v45 }
 0x482   :  { %819 = vrot.lane.b32.xlu1 %v818_v46, %s2220_s5 }
 0x4f4   :  { %v820_v47 = vpop.permute.xlu1 %819 }
 0x4f5   :  { %1593 = vmatmul.mubr.msk.f32.vlgmr.msra.gmra.mrb[10].mxu1 %vm510_vm0, %v820_v47 }
 0x4f6   :  { %2028 = vmatpush1.bf16.msra.mxu1 %v2725_v27  ;;  %1107 = vmatprep.mubr.f32.mxu1 %v2219_v0 }
 0x4f7   :  { %2030 = vmatprep.subr.bf16.mxu1 %v2746_v36 }
 0x4fa   :  { %2032 = vmatpush1.bf16.msra.mxu1 %v2755_v39 }
 0x4fb   :  { %2034 = vmatprep.subr.bf16.mxu1 %v2782_v50 }
 0x4fe   :  { %2036 = vmatpush1.bf16.msra.mxu1 %v2784_v51 }
 0x4ff   :  { %2038 = vmatprep.subr.bf16.mxu1 %v2812_v62 }
 0x502   :  { %2040 = vmatpush1.bf16.msra.mxu1 %v2814_v63 }
 0x503   :  { %2058 = vmatprep.subr.bf16.mxu1 %v2716_v24 }
 0x5c8   :  { %v889_v48 = vpop.f32.mrb[10].mxu1 }
 0x5c9   :  { %v896_v52 = vrot.slane %v889_v48, 4  ;;  %v891_v53 = vpop.f32.mrb[11].mxu1 }
 0x5ca   :  { %v897_v56 = vrot.slane %v891_v53, 4 }
 0x5cb   :  { %v900_v54 = vadd.f32 %v896_v52, %v2860_v49 }
 0x5cc   :  { %v901_v58 = vadd.f32 %v897_v56, %v2867_v60 }
 0x5cd   :  { %v1594_v55 = vmul.f32 -1.442695, %v900_v54 }
 0x5ce   :  { %v1595_v7 = vmul.f32 -1.442695, %v901_v58 }
 0x5cf   :  { %2147 = vpow2.f32 %v1594_v55 }
 0x5d0   :  { %2149 = vtanh.f32 %v901_v58 }
 0x5d9   :  { %v2148_v61 = vpop.eup %2147 }
 0x5da   :  { %v905_v1 = vadd.f32 1.0, %v2148_v61  ;;  %v2150_v2 = vpop.eup %2149 }
 0x5dc   :  { %2151 = vrcp.f32 %v905_v1 }
 0x5dd   :  { %2153 = vpow2.f32 %v1595_v7 }
 0x5e6   :  { %v2152_v4 = vpop.eup %2151 }
 0x5e7   :  { %v919_v5 = vmul.f32 %v2152_v4, %v2150_v2  ;;  %v918_v6 = vmul.f32 %v2152_v4, %v916_v3  ;;  %v2154_v8 = vpop.eup %2153 }
 0x5e8   :  { %v912_v9 = vadd.f32 1.0, %v2154_v8 }
 0x5e9   :  { %921 = vrot.lane.b32.xlu0 %v919_v5, %s2220_s5 }
 0x5ea   :  { %2155 = vrcp.f32 %v912_v9 }
 0x5f4   :  { %v2156_v12 = vpop.eup %2155 }
 0x65b   :  { %v922_v10 = vpop.permute.xlu0 %921 }
 0x65c   :  { %v924_v11 = vadd.f32 %v922_v10, %v918_v6 }
 0x65e   :  { %2157 = vtanh.f32 %v924_v11  ;;  %v1026_v32 = vrot.slane %v924_v11, 6 }
 0x668   :  { %v2158_v13 = vpop.eup %2157 }
 0x669   :  { %v926_v15 = vmul.f32 %v2158_v13, %v2156_v12 }
 0x66b   :  { %v928_v17 = vrot.slane %v926_v15, 4  ;;  %v1473_v18 = vsel %vm1472_vm2, %v1471_v16, %v926_v15 }
 0x66d   :  { %929 = vrot.lane.b32.xlu1 %v928_v17, %s2220_s5 }
 0x6df   :  { %v930_v19 = vpop.permute.xlu1 %929 }
 0x6e0   :  { %1596 = vmatmul.mubr.msk.f32.vlgmr.msra.gmra.mrb[14].mxu0 %vm510_vm0, %v930_v19 }
 0x6e1   :  { %2044 = vmatpush1.bf16.msra.mxu0 %v2725_v27  ;;  %1210 = vmatprep.mubr.f32.mxu0 %v2219_v0 }
 0x6e2   :  { %2046 = vmatprep.subr.bf16.mxu0 %v2746_v36 }
 0x6e5   :  { %2048 = vmatpush1.bf16.msra.mxu0 %v2755_v39 }
 0x6e6   :  { %2050 = vmatprep.subr.bf16.mxu0 %v2782_v50 }
 0x6e9   :  { %2052 = vmatpush1.bf16.msra.mxu0 %v2784_v51 }
 0x6ea   :  { %2054 = vmatprep.subr.bf16.mxu0 %v2812_v62 }
 0x6ed   :  { %2056 = vmatpush1.bf16.msra.mxu0 %v2814_v63 }
 0x6ee   :  { %2074 = vmatprep.subr.bf16.mxu0 %v2716_v24 }
 0x7b3   :  { %v999_v14 = vpop.f32.mrb[14].mxu0 }
 0x7b4   :  { %v1006_v20 = vrot.slane %v999_v14, 2  ;;  %v1001_v21 = vpop.f32.mrb[15].mxu0 }
 0x7b5   :  { %v1007_v25 = vrot.slane %v1001_v21, 2 }
 0x7b6   :  { %v1010_v22 = vadd.f32 %v1006_v20, %v2860_v49 }
 0x7b7   :  { %v1011_v26 = vadd.f32 %v1007_v25, %v2867_v60 }
 0x7b8   :  { %v1597_v23 = vmul.f32 -1.442695, %v1010_v22 }
 0x7b9   :  { %v1598_v24 = vmul.f32 -1.442695, %v1011_v26 }
 0x7ba   :  { %2159 = vpow2.f32 %v1597_v23 }
 0x7bb   :  { %2161 = vtanh.f32 %v1011_v26 }
 0x7c4   :  { %v2160_v28 = vpop.eup %2159 }
 0x7c5   :  { %v1015_v29 = vadd.f32 1.0, %v2160_v28  ;;  %v2162_v31 = vpop.eup %2161 }
 0x7c7   :  { %2163 = vrcp.f32 %v1015_v29 }
 0x7c8   :  { %2165 = vpow2.f32 %v1598_v24 }
 0x7d1   :  { %v2164_v33 = vpop.eup %2163 }
 0x7d2   :  { %v1029_v35 = vmul.f32 %v2164_v33, %v2162_v31  ;;  %v1028_v40 = vmul.f32 %v2164_v33, %v1026_v32  ;;  %v2166_v41 = vpop.eup %2165 }
 0x7d3   :  { %v1022_v49 = vadd.f32 1.0, %v2166_v41 }
 0x7d4   :  { %1031 = vrot.lane.b32.xlu0 %v1029_v35, %s2220_s5 }
 0x7d5   :  { %2167 = vrcp.f32 %v1022_v49 }
 0x7df   :  { %v2168_v60 = vpop.eup %2167 }
 0x846   :  { %v1032_v42 = vpop.permute.xlu0 %1031 }
 0x847   :  { %v1034_v43 = vadd.f32 %v1032_v42, %v1028_v40 }
 0x849   :  { %2169 = vtanh.f32 %v1034_v43  ;;  %v1130_v2 = vrot.slane %v1034_v43, 6 }
 0x853   :  { %v2170_v44 = vpop.eup %2169 }
 0x854   :  { %v1036_v45 = vmul.f32 %v2170_v44, %v2168_v60 }
 0x856   :  { %v1038_v46 = vrot.slane %v1036_v45, 6  ;;  %v2920_v47 = vsel %vm1474_vm3, %v1473_v18, %v1036_v45 }
 0x857   :  { %v1479_v35 = vsel %vm510_vm0, %v480_v34, %v2920_v47 }
 0x858   :  { %1039 = vrot.lane.b32.xlu1 %v1038_v46, %s2220_s5 }
 0x8ca   :  { %v1040_v48 = vpop.permute.xlu1 %1039 }
 0x8cb   :  { %1599 = vmatmul.mubr.msk.f32.vlgmr.msra.gmra.mrb[12].mxu1 %vm510_vm0, %v1040_v48 }
 0x8cc   :  { %2060 = vmatpush1.bf16.msra.mxu1 %v2725_v27  ;;  %1320 = vmatprep.mubr.f32.mxu1 %v2219_v0 }
 0x8cd   :  { %2062 = vmatprep.subr.bf16.mxu1 %v2746_v36 }
 0x8d0   :  { %2064 = vmatpush1.bf16.msra.mxu1 %v2755_v39 }
 0x8d1   :  { %2066 = vmatprep.subr.bf16.mxu1 %v2782_v50 }
 0x8d4   :  { %2068 = vmatpush1.bf16.msra.mxu1 %v2784_v51 }
 0x8d5   :  { %2070 = vmatprep.subr.bf16.mxu1 %v2812_v62 }
 0x8d8   :  { %2072 = vmatpush1.bf16.msra.mxu1 %v2814_v63 }
 0x99e   :  { %v1109_v52 = vpop.f32.mrb[12].mxu1 }
 0x99f   :  { %v1114_v53 = vadd.f32 %v1109_v52, %v2863_v57  ;;  %v1111_v54 = vpop.f32.mrb[13].mxu1 }
 0x9a0   :  { %v1115_v56 = vadd.f32 %v1111_v54, %v2865_v59 }
 0x9a1   :  { %v1600_v55 = vmul.f32 -1.442695, %v1114_v53 }
 0x9a2   :  { %v1601_v6 = vmul.f32 -1.442695, %v1115_v56 }
 0x9a3   :  { %2171 = vpow2.f32 %v1600_v55 }
 0x9a4   :  { %2173 = vtanh.f32 %v1115_v56 }
 0x9ad   :  { %v2172_v58 = vpop.eup %2171 }
 0x9ae   :  { %v1119_v61 = vadd.f32 1.0, %v2172_v58  ;;  %v2174_v1 = vpop.eup %2173 }
 0x9b0   :  { %2175 = vrcp.f32 %v1119_v61 }
 0x9b1   :  { %2177 = vpow2.f32 %v1601_v6  ;;  %v1481_v6 = vld [vmem:[%s3042_s6] sm:$0xff] }
 0x9ba   :  { %v2176_v3 = vpop.eup %2175 }
 0x9bb   :  { %v1133_v4 = vmul.f32 %v2176_v3, %v2174_v1  ;;  %v1132_v5 = vmul.f32 %v2176_v3, %v1130_v2  ;;  %v2178_v7 = vpop.eup %2177 }
 0x9bc   :  { %v1126_v8 = vadd.f32 1.0, %v2178_v7  ;;  %v1482_v7 = vld [vmem:[%s3042_s6 + $0x8] sm:$0xff] }
 0x9bd   :  { %1135 = vrot.lane.b32.xlu0 %v1133_v4, %s2220_s5 }
 0x9be   :  { %2179 = vrcp.f32 %v1126_v8  ;;  %v1483_v8 = vld [vmem:[%s3042_s6 + $0x10] sm:$0xff] }
 0x9c8   :  { %v2180_v11 = vpop.eup %2179 }
 0xa2f   :  { %v1136_v9 = vpop.permute.xlu0 %1135 }
 0xa30   :  { %v1138_v10 = vadd.f32 %v1136_v9, %v1132_v5  ;;  %v2089_v9 = vpack.c.bf16 %v1482_v7, %v1481_v6 }
 0xa32   :  { %2181 = vtanh.f32 %v1138_v10  ;;  %2090 = vmatprep.subr.bf16.mxu1 %v2089_v9 }
 0xa3c   :  { %v2182_v12 = vpop.eup %2181 }
 0xa3d   :  { %v2935_v13 = vmul.f32 %v2182_v12, %v2180_v11  ;;  %v1485_v12 = vld [vmem:[%s3042_s6 + $0x20] sm:$0xff] }
 0xa3f   :  { %1142 = vrot.lane.b32.xlu1 %v2935_v13, %s2220_s5 }
 0xab1   :  { %v1143_v15 = vpop.permute.xlu1 %1142 }
 0xab2   :  { %1602 = vmatmul.mubr.msk.f32.vlgmr.msra.gmra.mrb[16].mxu0 %vm510_vm0, %v1143_v15 }
 0xab3   :  { %2076 = vmatpush1.bf16.msra.mxu0 %v2725_v27  ;;  %1430 = vmatprep.mubr.f32.mxu0 %v2219_v0 }
 0xab4   :  { %2078 = vmatprep.subr.bf16.mxu0 %v2746_v36 }
 0xab7   :  { %2080 = vmatpush1.bf16.msra.mxu0 %v2755_v39 }
 0xab8   :  { %2082 = vmatprep.subr.bf16.mxu0 %v2782_v50 }
 0xabb   :  { %2084 = vmatpush1.bf16.msra.mxu0 %v2784_v51  ;;  %v1239_v51 = vrot.slane %v1138_v10, 6  ;;  %v1484_v10 = vld [vmem:[%s3042_s6 + $0x18] sm:$0xff] }
 0xabc   :  { %2086 = vmatprep.subr.bf16.mxu0 %v2812_v62  ;;  %v2093_v11 = vpack.c.bf16 %v1484_v10, %v1483_v8 }
 0xabf   :  { %2088 = vmatpush1.bf16.msra.mxu0 %v2814_v63 }
 0xb85   :  { %v1212_v16 = vpop.f32.mrb[16].mxu0 }
 0xb86   :  { %v1219_v17 = vrot.slane %v1212_v16, 6  ;;  %v1214_v18 = vpop.f32.mrb[17].mxu0  ;;  %v1487_v16 = vld [vmem:[%s3042_s6 + $0x30] sm:$0xff] }
 0xb87   :  { %v1220_v0 = vrot.slane %v1214_v18, 6 }
 0xb88   :  { %v1223_v19 = vadd.f32 %v1219_v17, %v2863_v57  ;;  %v1488_v17 = vld [vmem:[%s3042_s6 + $0x38] sm:$0xff] }
 0xb89   :  { %v1224_v36 = vadd.f32 %v1220_v0, %v2865_v59  ;;  %v2101_v18 = vpack.c.bf16 %v1488_v17, %v1487_v16 }
 0xb8a   :  { %v1603_v27 = vmul.f32 -1.442695, %v1223_v19 }
 0xb8b   :  { %v1604_v63 = vmul.f32 -1.442695, %v1224_v36 }
 0xb8c   :  { %2183 = vpow2.f32 %v1603_v27 }
 0xb8d   :  { %2185 = vtanh.f32 %v1224_v36 }
 0xb96   :  { %v2184_v14 = vpop.eup %2183 }
 0xb97   :  { %v1228_v39 = vadd.f32 1.0, %v2184_v14  ;;  %v2186_v50 = vpop.eup %2185 }
 0xb99   :  { %2187 = vrcp.f32 %v1228_v39 }
 0xb9a   :  { %2189 = vpow2.f32 %v1604_v63 }
 0xba3   :  { %v2188_v20 = vpop.eup %2187 }
 0xba4   :  { %v1242_v62 = vmul.f32 %v2188_v20, %v2186_v50  ;;  %v1241_v21 = vmul.f32 %v2188_v20, %v1239_v51  ;;  %v2190_v22 = vpop.eup %2189 }
 0xba5   :  { %v1235_v23 = vadd.f32 1.0, %v2190_v22  ;;  %v1493_v22 = vld [vmem:[%s3042_s6 + $0x60] sm:$0xff] }
 0xba6   :  { %1244 = vrot.lane.b32.xlu0 %v1242_v62, %s2220_s5  ;;  %v1489_v62 = vld [vmem:[%s3042_s6 + $0x40] sm:$0xff] }
 0xba7   :  { %2191 = vrcp.f32 %v1235_v23 }
 0xbb1   :  { %v2192_v28 = vpop.eup %2191 }
 0xc18   :  { %v1245_v25 = vpop.permute.xlu0 %1244 }
 0xc19   :  { %v1247_v26 = vadd.f32 %v1245_v25, %v1241_v21  ;;  %v1490_v21 = vld [vmem:[%s3042_s6 + $0x48] sm:$0xff] }
 0xc1a   :  { %v2105_v63 = vpack.c.bf16 %v1490_v21, %v1489_v62  ;;  %v1494_v25 = vld [vmem:[%s3042_s6 + $0x68] sm:$0xff] }
 0xc1b   :  { %2193 = vtanh.f32 %v1247_v26  ;;  %v1349_v48 = vrot.slane %v1247_v26, 6  ;;  %v2113_v26 = vpack.c.bf16 %v1494_v25, %v1493_v22 }
 0xc25   :  { %v2194_v29 = vpop.eup %2193 }
 0xc26   :  { %v1249_v31 = vmul.f32 %v2194_v29, %v2192_v28  ;;  %v1495_v28 = vld [vmem:[%s3042_s6 + $0x70] sm:$0xff]  ;;  %v1496_v29 = vld [vmem:[%s3042_s6 + $0x78] sm:$0xff] }
 0xc28   :  { %v1251_v32 = vrot.slane %v1249_v31, 2  ;;  %v1476_v2 = vsel %vm1470_vm1, %v2935_v13, %v1249_v31  ;;  %v1486_v13 = vld [vmem:[%s3042_s6 + $0x28] sm:$0xff]  ;;  %v2117_v31 = vpack.c.bf16 %v1496_v29, %v1495_v28 }
 0xc29   :  { %v2097_v15 = vpack.c.bf16 %v1486_v13, %v1485_v12 }
 0xc2a   :  { %1252 = vrot.lane.b32.xlu1 %v1251_v32, %s2220_s5 }
 0xc9c   :  { %v1253_v33 = vpop.permute.xlu1 %1252 }
 0xc9d   :  { %1605 = vmatmul.mubr.msk.f32.vlgmr.msra.gmra.mrb[14].mxu1 %vm510_vm0, %v1253_v33 }
 0xc9e   :  { %1814 = vmatprep.mubr.f32.mxu1 %v1479_v35  ;;  %2092 = vmatpush3.bf16.msra.mxu1 %v2089_v9 }
 0xc9f   :  { %2094 = vmatprep.subr.bf16.mxu1 %v2093_v11 }
 0xca2   :  { %2096 = vmatpush3.bf16.msra.mxu1 %v2093_v11 }
 0xca3   :  { %2098 = vmatprep.subr.bf16.mxu1 %v2097_v15 }
 0xca6   :  { %2100 = vmatpush3.bf16.msra.mxu1 %v2097_v15 }
 0xca7   :  { %2102 = vmatprep.subr.bf16.mxu1 %v2101_v18 }
 0xcaa   :  { %2104 = vmatpush3.bf16.msra.mxu1 %v2101_v18 }
 0xcab   :  { %2106 = vmatprep.subr.bf16.mxu1 %v2105_v63 }
 0xcae   :  { %2108 = vmatpush3.bf16.msra.mxu1 %v2105_v63 }
 0xd70   :  { %v1322_v40 = vpop.f32.mrb[14].mxu1 }
 0xd71   :  { %v1329_v24 = vrot.slane %v1322_v40, 4  ;;  %v1324_v41 = vpop.f32.mrb[15].mxu1 }
 0xd72   :  { %v1330_v43 = vrot.slane %v1324_v41, 4 }
 0xd73   :  { %v1333_v49 = vadd.f32 %v1329_v24, %v2863_v57 }
 0xd74   :  { %v1334_v60 = vadd.f32 %v1330_v43, %v2865_v59 }
 0xd75   :  { %v1606_v42 = vmul.f32 -1.442695, %v1333_v49 }
 0xd76   :  { %v1607_v47 = vmul.f32 -1.442695, %v1334_v60 }
 0xd77   :  { %2195 = vpow2.f32 %v1606_v42 }
 0xd78   :  { %2197 = vtanh.f32 %v1334_v60 }
 0xd81   :  { %v2196_v44 = vpop.eup %2195 }
 0xd82   :  { %v1338_v45 = vadd.f32 1.0, %v2196_v44  ;;  %v2198_v46 = vpop.eup %2197 }
 0xd84   :  { %2199 = vrcp.f32 %v1338_v45 }
 0xd85   :  { %2201 = vpow2.f32 %v1607_v47 }
 0xd8e   :  { %v2200_v30 = vpop.eup %2199 }
 0xd8f   :  { %v1352_v52 = vmul.f32 %v2200_v30, %v2198_v46  ;;  %v1351_v34 = vmul.f32 %v2200_v30, %v1349_v48  ;;  %v2202_v53 = vpop.eup %2201 }
 0xd90   :  { %v1345_v54 = vadd.f32 1.0, %v2202_v53 }
 0xd91   :  { %1354 = vrot.lane.b32.xlu0 %v1352_v52, %s2220_s5  ;;  %v1611_v52 = vld [vmem:[%s3043_s7] ss:$0 sm:$0xff] }
 0xd92   :  { %2203 = vrcp.f32 %v1345_v54 }
 0xd9c   :  { %v2204_v58 = vpop.eup %2203 }
 0xe03   :  { %v1355_v55 = vpop.permute.xlu0 %1354 }
 0xe04   :  { %v2960_v56 = vadd.f32 %v1355_v55, %v1351_v34 }
 0xe06   :  { %2205 = vtanh.f32 %v2960_v56  ;;  %v1459_v33 = vrot.slane %v2960_v56, 6 }
 0xe10   :  { %v2206_v61 = vpop.eup %2205 }
 0xe11   :  { %v1359_v1 = vmul.f32 %v2206_v61, %v2204_v58 }
 0xe13   :  { %v1361_v3 = vrot.slane %v1359_v1, 4  ;;  %v2966_v4 = vsel %vm1472_vm2, %v1476_v2, %v1359_v1 }
 0xe15   :  { %1362 = vrot.lane.b32.xlu1 %v1361_v3, %s2220_s5 }
 0xe87   :  { %v1363_v5 = vpop.permute.xlu1 %1362 }
 0xe88   :  { %1608 = vmatmul.mubr.msk.f32.vlgmr.msra.gmra.mrb[18].mxu0 %vm510_vm0, %v1363_v5 }
 0xf5b   :  { %v1432_v19 = vpop.f32.mrb[18].mxu0 }
 0xf5c   :  { %v1439_v27 = vrot.slane %v1432_v19, 2  ;;  %v1434_v0 = vpop.f32.mrb[19].mxu0 }
 0xf5d   :  { %v1440_v39 = vrot.slane %v1434_v0, 2 }
 0xf5e   :  { %v1443_v36 = vadd.f32 %v1439_v27, %v2863_v57  ;;  %v1491_v57 = vld [vmem:[%s3042_s6 + $0x50] sm:$0xff] }
 0xf5f   :  { %v1444_v50 = vadd.f32 %v1440_v39, %v2865_v59  ;;  %v1492_v59 = vld [vmem:[%s3042_s6 + $0x58] sm:$0xff] }
 0xf60   :  { %v1609_v14 = vmul.f32 -1.442695, %v1443_v36  ;;  %v2109_v23 = vpack.c.bf16 %v1492_v59, %v1491_v57 }
 0xf61   :  { %v1610_v41 = vmul.f32 -1.442695, %v1444_v50 }
 0xf62   :  { %2207 = vpow2.f32 %v1609_v14  ;;  %2110 = vmatprep.subr.bf16.mxu1 %v2109_v23 }
 0xf63   :  { %2209 = vtanh.f32 %v1444_v50  ;;  %2112 = vmatpush3.bf16.msra.mxu1 %v2109_v23 }
 0xf64   :  { %2114 = vmatprep.subr.bf16.mxu1 %v2113_v26 }
 0xf67   :  { %2116 = vmatpush3.bf16.msra.mxu1 %v2113_v26 }
 0xf68   :  { %2118 = vmatprep.subr.bf16.mxu1 %v2117_v31 }
 0xf6b   :  { %2120 = vmatpush3.bf16.msra.mxu1 %v2117_v31 }
 0xf6c   :  { %v2208_v51 = vpop.eup %2207 }
 0xf6d   :  { %v1448_v20 = vadd.f32 1.0, %v2208_v51  ;;  %v2210_v32 = vpop.eup %2209 }
 0xf6f   :  { %2211 = vrcp.f32 %v1448_v20 }
 0xf70   :  { %2213 = vpow2.f32 %v1610_v41 }
 0xf79   :  { %v2212_v35 = vpop.eup %2211 }
 0xf7a   :  { %v1462_v40 = vmul.f32 %v2212_v35, %v2210_v32  ;;  %v1461_v24 = vmul.f32 %v2212_v35, %v1459_v33  ;;  %v2214_v49 = vpop.eup %2213 }
 0xf7b   :  { %v1455_v42 = vadd.f32 1.0, %v2214_v49 }
 0xf7c   :  { %1464 = vrot.lane.b32.xlu0 %v1462_v40, %s2220_s5 }
 0xf7d   :  { %2215 = vrcp.f32 %v1455_v42 }
 0xf87   :  { %v2216_v44 = vpop.eup %2215 }
 0xfee   :  { %v1465_v43 = vpop.permute.xlu0 %1464 }
 0xfef   :  { %v1467_v60 = vadd.f32 %v1465_v43, %v1461_v24 }
 0xff1   :  { %2217 = vtanh.f32 %v1467_v60 }
 0xffb   :  { %v2218_v45 = vpop.eup %2217 }
 0xffc   :  { %v1469_v46 = vmul.f32 %v2218_v45, %v2216_v44 }
 0xffe   :  { %v1478_v48 = vsel %vm1474_vm3, %v2966_v4, %v1469_v46 }
 0xfff   :  { %v1480_v30 = vsel %vm510_vm0, %v481_v38, %v1478_v48 }
0x1000   :  { %1815 = vmatmul.mubr.f32.vlgmr.msra.gmra.mrb[16].mxu1 %v1480_v30 }
0x10d3   :  { %v1816_v34 = vpop.f32.mrb[16].mxu1 }
0x10d4   :  { %v1576_v47 = vadd.f32 %v1816_v34, %v1611_v52  ;;  %v1570_v53 = vpop.f32.mrb[17].mxu1 }
0x10d5   :  { %v1571_v54 = vadd.f32 %v1611_v52, %v1570_v53 }
0x10d6   :  { %1580 = vst [vmem:[%s3044_s8 + $0x8] sm:$0xff] %v1576_v47 }
0x10d7   :  { %1579 = vst [vmem:[%s3044_s8] sm:$0xff] %v1571_v54 }

</bundles_post_ra>
